<compile_context>
chip_gen: v7x
topology: tpu7x:2x2x1
jax: 0.10.0
libtpu: 0.0.40
codegen_flags: <defaults>
</compile_context>

<pallas_src>
import math
from functools import partial

import jax
import jax.numpy as jnp
from jax.experimental import pallas as pl
from jax.experimental.pallas import tpu as pltpu


# ----------------------------------------------------------------------------
# Kernel 1: fused QKV projection into head-major layout.
#   grid = (B, T//tt), both parallel.
#   x   : (1, tt, C)      bf16
#   w   : (C, 3C)         bf16  (resident; Q columns pre-scaled by 1/sqrt(hd))
#   b   : (1, 3C)         f32   (Q part pre-scaled)
#   q/k/v out: (1, nh, tt, hd)  bf16  (head-major, no in-kernel transposes)
# ----------------------------------------------------------------------------
def _qkv_proj_kernel(x_ref, w_ref, b_ref, q_ref, k_ref, v_ref, *,
                     n_head, head_dim):
    x = x_ref[0]                                              # (tt, C) bf16
    qkv = jnp.dot(x, w_ref[...], preferred_element_type=jnp.float32)
    qkv = qkv + b_ref[...]                                    # (tt, 3C) f32
    C = n_head * head_dim
    for h in range(n_head):                                   # static unroll
        o = h * head_dim
        q_ref[0, h] = qkv[:, o:o + head_dim].astype(q_ref.dtype)
        k_ref[0, h] = qkv[:, C + o:C + o + head_dim].astype(k_ref.dtype)
        v_ref[0, h] = qkv[:, 2 * C + o:2 * C + o + head_dim].astype(v_ref.dtype)


# ----------------------------------------------------------------------------
# Kernel 2: flash attention (online softmax) over a triangular step table +
# fused full-width output projection.
#   grid = (B, n_steps); step s -> (qi, h, ki) via scalar-prefetch tables,
#   ordered qi-major, then head, then ki in [0, qi]  (NO causal no-op steps).
#   q/k/v : (1, 1, tq, hd) bf16   wp: (C, C) bf16 resident   bp: (1, C) f32
#   out   : (1, tq, C)     x.dtype
#   scratch: m (tq,1) f32, l (tq,1) f32, acc (tq,hd) f32, y_heads (nh,tq,hd) bf16
# ----------------------------------------------------------------------------
def _flash_attn_proj_kernel(qi_tab, h_tab, ki_tab,
                            q_ref, k_ref, v_ref, wp_ref, bp_ref, o_ref,
                            m_sc, l_sc, acc_sc, yh_sc, *, n_head):
    s_idx = pl.program_id(1)
    qi = qi_tab[s_idx]
    h = h_tab[s_idx]
    ki = ki_tab[s_idx]

    # New head for this query tile: reset the online-softmax state.
    @pl.when(ki == 0)
    def _():
        m_sc[...] = jnp.full_like(m_sc, -jnp.inf)
        l_sc[...] = jnp.zeros_like(l_sc)
        acc_sc[...] = jnp.zeros_like(acc_sc)

    q = q_ref[0, 0]                                           # (tq, hd) bf16
    k = k_ref[0, 0]                                           # (tk, hd) bf16
    # q @ k^T on the MXU (contraction over hd), f32 accumulation.
    s = jax.lax.dot_general(
        q, k, dimension_numbers=(((1,), (1,)), ((), ())),
        preferred_element_type=jnp.float32)                   # (tq, tk) f32

    # Unconditional, predicate-folded causal mask: only the diagonal tile
    # (ki == qi) is masked; all other visited tiles (ki < qi) are unmasked.
    row = jax.lax.broadcasted_iota(jnp.int32, s.shape, 0)
    col = jax.lax.broadcasted_iota(jnp.int32, s.shape, 1)
    keep = jnp.logical_or(ki != qi, col <= row)
    s = jnp.where(keep, s, -jnp.inf)

    # Online softmax update (f32).
    m_prev = m_sc[...]                                        # (tq, 1)
    m_new = jnp.maximum(m_prev, jnp.max(s, axis=-1, keepdims=True))
    alpha = jnp.exp(m_prev - m_new)
    p = jnp.exp(s - m_new)                                    # (tq, tk) f32
    l_sc[...] = alpha * l_sc[...] + jnp.sum(p, axis=-1, keepdims=True)
    acc_sc[...] = alpha * acc_sc[...] + jnp.dot(
        p.astype(jnp.bfloat16), v_ref[0, 0],
        preferred_element_type=jnp.float32)                   # (tq, hd) f32
    m_sc[...] = m_new

    # Last K tile for this head: normalize and stash y_h for this head.
    @pl.when(ki == qi)
    def _():
        y_h = acc_sc[...] * pl.reciprocal(l_sc[...], approx=True)
        yh_sc[h] = y_h.astype(yh_sc.dtype)                    # dyn 1st-axis store

    # Last head for this (b, qi): one full-depth (tq,C)@(C,C) projection.
    @pl.when(jnp.logical_and(h == n_head - 1, ki == qi))
    def _():
        parts = [yh_sc[hh] for hh in range(n_head)]           # static reads
        y_full = parts[0] if n_head == 1 else jnp.concatenate(parts, axis=-1)
        out = jnp.dot(y_full, wp_ref[...],
                      preferred_element_type=jnp.float32)     # (tq, C) f32
        o_ref[0] = (out + bp_ref[...]).astype(o_ref.dtype)


# ----------------------------------------------------------------------------
# Wrapper
# ----------------------------------------------------------------------------
def causal_self_attention(x, w_qkv, b_qkv, w_proj, b_proj, *, n_head,
                          tile_t=256, tile_qk=256):
    """x: (B, T, C) f32; w_qkv: (C, 3C); b_qkv: (3C,); w_proj: (C, C); b_proj: (C,).

    Weights are stored transposed vs torch.nn.Linear, i.e. (in, out), so the
    kernels compute x @ W + b directly.
    """
    B, T, C = x.shape
    nh = n_head
    assert C % nh == 0
    hd = C // nh

    tt = min(tile_t, T)
    tq = min(tile_qk, T)            # tq == tk (causal diag mask assumes this)
    assert T % tt == 0 and T % tq == 0, "T must be divisible by the tile sizes"

    scale = 1.0 / math.sqrt(hd)

    # ---- one-time weight prep in the wrapper (keeps kernels transpose-free)
    w_fused = jnp.concatenate([w_qkv[:, :C] * scale, w_qkv[:, C:]],
                              axis=1).astype(jnp.bfloat16)       # (C, 3C)
    b_fused = jnp.concatenate([b_qkv[:C] * scale, b_qkv[C:]]
                              ).reshape(1, 3 * C).astype(jnp.float32)
    wp = w_proj.astype(jnp.bfloat16)                             # (C, C)
    bp = b_proj.reshape(1, C).astype(jnp.float32)
    x_bf = x.astype(jnp.bfloat16)

    # ---- Kernel 1: fused QKV projection (weights resident) ----
    nT = T // tt
    qkv_kernel = partial(_qkv_proj_kernel, n_head=nh, head_dim=hd)
    q, k, v = pl.pallas_call(
        qkv_kernel,
        out_shape=(
            jax.ShapeDtypeStruct((B, nh, T, hd), jnp.bfloat16),
            jax.ShapeDtypeStruct((B, nh, T, hd), jnp.bfloat16),
            jax.ShapeDtypeStruct((B, nh, T, hd), jnp.bfloat16),
        ),
        grid_spec=pltpu.PrefetchScalarGridSpec(
            num_scalar_prefetch=0,
            grid=(B, nT),
            in_specs=[
                pl.BlockSpec((1, tt, C), lambda b, t: (b, t, 0)),    # x
                pl.BlockSpec((C, 3 * C), lambda b, t: (0, 0)),       # W (resident)
                pl.BlockSpec((1, 3 * C), lambda b, t: (0, 0)),       # b (resident)
            ],
            out_specs=[
                pl.BlockSpec((1, nh, tt, hd), lambda b, t: (b, 0, t, 0)),
                pl.BlockSpec((1, nh, tt, hd), lambda b, t: (b, 0, t, 0)),
                pl.BlockSpec((1, nh, tt, hd), lambda b, t: (b, 0, t, 0)),
            ],
        ),
        compiler_params=pltpu.CompilerParams(
            dimension_semantics=("parallel", "parallel"),
            vmem_limit_bytes=48 * 1024 * 1024,
        ),
    )(x_bf, w_fused, b_fused)

    # ---- Kernel 2: flash attention over triangular step table + fused proj ----
    nQ = T // tq
    qi_l, h_l, ki_l = [], [], []
    for qi in range(nQ):
        for h in range(nh):
            for ki in range(qi + 1):         # only causally-needed K tiles
                qi_l.append(qi)
                h_l.append(h)
                ki_l.append(ki)
    qi_tab = jnp.asarray(qi_l, dtype=jnp.int32)
    h_tab = jnp.asarray(h_l, dtype=jnp.int32)
    ki_tab = jnp.asarray(ki_l, dtype=jnp.int32)
    n_steps = len(qi_l)                      # nh * nQ*(nQ+1)/2 — no wasted steps

    attn_kernel = partial(_flash_attn_proj_kernel, n_head=nh)
    out = pl.pallas_call(
        attn_kernel,
        out_shape=jax.ShapeDtypeStruct((B, T, C), x.dtype),
        grid_spec=pltpu.PrefetchScalarGridSpec(
            num_scalar_prefetch=3,
            grid=(B, n_steps),
            in_specs=[
                pl.BlockSpec((1, 1, tq, hd),
                             lambda b, s, qt, ht, kt: (b, ht[s], qt[s], 0)),   # q
                pl.BlockSpec((1, 1, tq, hd),
                             lambda b, s, qt, ht, kt: (b, ht[s], kt[s], 0)),   # k
                pl.BlockSpec((1, 1, tq, hd),
                             lambda b, s, qt, ht, kt: (b, ht[s], kt[s], 0)),   # v
                pl.BlockSpec((C, C),
                             lambda b, s, qt, ht, kt: (0, 0)),                 # Wproj (resident)
                pl.BlockSpec((1, C),
                             lambda b, s, qt, ht, kt: (0, 0)),                 # bproj (resident)
            ],
            out_specs=pl.BlockSpec((1, tq, C),
                                   lambda b, s, qt, ht, kt: (b, qt[s], 0)),
            scratch_shapes=[
                pltpu.VMEM((tq, 1), jnp.float32),      # running max
                pltpu.VMEM((tq, 1), jnp.float32),      # running sum
                pltpu.VMEM((tq, hd), jnp.float32),     # attention accumulator
                pltpu.VMEM((nh, tq, hd), jnp.bfloat16),  # per-head normalized y
            ],
        ),
        compiler_params=pltpu.CompilerParams(
            dimension_semantics=("parallel", "arbitrary"),
            vmem_limit_bytes=48 * 1024 * 1024,
        ),
    )(qi_tab, h_tab, ki_tab, q, k, v, wp, bp)

    return out


# ----------------------------------------------------------------------------
# Plain-JAX f32 reference (mirrors the PyTorch forward, eval mode, no cache)
# ----------------------------------------------------------------------------
def _reference(x, w_qkv, b_qkv, w_proj, b_proj, n_head):
    B, T, C = x.shape
    hd = C // n_head
    qkv = x @ w_qkv + b_qkv
    q, k, v = jnp.split(qkv, 3, axis=-1)
    q = q.reshape(B, T, n_head, hd).transpose(0, 2, 1, 3)
    k = k.reshape(B, T, n_head, hd).transpose(0, 2, 1, 3)
    v = v.reshape(B, T, n_head, hd).transpose(0, 2, 1, 3)
    att = jnp.einsum('bhtd,bhsd->bhts', q, k) / math.sqrt(hd)
    mask = jnp.tril(jnp.ones((T, T), dtype=bool))
    att = jnp.where(mask[None, None], att, -jnp.inf)
    att = jax.nn.softmax(att, axis=-1)
    y = jnp.einsum('bhts,bhsd->bhtd', att, v)
    y = y.transpose(0, 2, 1, 3).reshape(B, T, C)
    return y @ w_proj + b_proj


if __name__ == "__main__":
    # Exercises: 2 q-tiles of 256 (triangular table has 1 + 2 K-tiles per head),
    # 2 heads with hd=128 (lane-aligned), batch 2.
    B, T, C, n_head = 2, 512, 256, 2

    key = jax.random.PRNGKey(0)
    kx, k1, k2, k3, k4 = jax.random.split(key, 5)

    x = jax.random.normal(kx, (B, T, C), dtype=jnp.float32)
    # Deterministic "init" of the Linear params (stored as (in, out)).
    w_qkv = jax.random.normal(k1, (C, 3 * C), dtype=jnp.float32) * 0.05
    b_qkv = jax.random.normal(k2, (3 * C,), dtype=jnp.float32) * 0.05
    w_proj = jax.random.normal(k3, (C, C), dtype=jnp.float32) * 0.05
    b_proj = jax.random.normal(k4, (C,), dtype=jnp.float32) * 0.05

    y = causal_self_attention(x, w_qkv, b_qkv, w_proj, b_proj, n_head=n_head)
    y = jax.block_until_ready(y)

    y_ref = _reference(x, w_qkv, b_qkv, w_proj, b_proj, n_head)
    assert y.shape == (B, T, C)
    # bf16 MXU operands (x, q, k, v, y, weights) with f32 accumulation ->
    # compare with bf16-level tolerance (max-abs error vs max-abs reference).
    rel_err = float(jnp.max(jnp.abs(y - y_ref)) / (jnp.max(jnp.abs(y_ref)) + 1e-6))
    assert rel_err < 3e-2, f"mismatch vs reference: rel-max err {rel_err:.3e}"

    print("KERNEL_OK")
</pallas_src>

<mosaic_0001>
module attributes {stable_mosaic.version = 11 : i64} {
  func.func @_qkv_proj_kernel(%arg0: i32, %arg1: i32, %arg2: memref<1x256x256xbf16, #tpu.memory_space<vmem>>, %arg3: memref<256x768xbf16, #tpu.memory_space<vmem>>, %arg4: memref<1x768xf32, #tpu.memory_space<vmem>>, %arg5: memref<1x2x256x128xbf16, #tpu.memory_space<vmem>>, %arg6: memref<1x2x256x128xbf16, #tpu.memory_space<vmem>>, %arg7: memref<1x2x256x128xbf16, #tpu.memory_space<vmem>>) attributes {dimension_semantics = [#tpu.dimension_semantics<parallel>, #tpu.dimension_semantics<parallel>], iteration_bounds = array<i64: 2, 2>, scalar_prefetch = 0 : i64, scratch_operands = 0 : i64, tpu.core_type = #tpu.core_type<tc>, window_params = [{transform_indices = @transform_0, window_bounds = array<i64: 1, 256, 256>}, {pipeline_mode = #tpu.pipeline_mode<synchronous>, transform_indices = @transform_1, window_bounds = array<i64: 256, 768>}, {pipeline_mode = #tpu.pipeline_mode<synchronous>, transform_indices = @transform_2, window_bounds = array<i64: 1, 768>}, {transform_indices = @transform_3, window_bounds = array<i64: 1, 2, 256, 128>}, {transform_indices = @transform_4, window_bounds = array<i64: 1, 2, 256, 128>}, {transform_indices = @transform_5, window_bounds = array<i64: 1, 2, 256, 128>}]} {
    %c0 = arith.constant 0 : index
    %c0_0 = arith.constant 0 : index
    %c0_1 = arith.constant 0 : index
    %0 = vector.load %arg2[%c0, %c0_0, %c0_1] : memref<1x256x256xbf16, #tpu.memory_space<vmem>>, vector<1x256x256xbf16>
    %1 = vector.shape_cast %0 : vector<1x256x256xbf16> to vector<256x256xbf16>
    %c0_2 = arith.constant 0 : index
    %c0_3 = arith.constant 0 : index
    %2 = vector.load %arg3[%c0_2, %c0_3] : memref<256x768xbf16, #tpu.memory_space<vmem>>, vector<256x768xbf16>
    %cst = arith.constant dense<0.000000e+00> : vector<256x768xf32>
    %3 = tpu.matmul %1, %2, %cst {dimension_numbers = #tpu.dot_dimension_numbers<[1], [0], [0], [1], [0, 0, 1, 1], [], []>} : vector<256x256xbf16>, vector<256x768xbf16>, vector<256x768xf32> -> vector<256x768xf32>
    %c0_4 = arith.constant 0 : index
    %c0_5 = arith.constant 0 : index
    %4 = vector.load %arg4[%c0_4, %c0_5] : memref<1x768xf32, #tpu.memory_space<vmem>>, vector<1x768xf32>
    %5 = vector.broadcast %4 : vector<1x768xf32> to vector<256x768xf32>
    %6 = arith.addf %3, %5 : vector<256x768xf32>
    %7 = vector.extract_strided_slice %6 {offsets = [0, 0], sizes = [256, 128], strides = [1, 1]} : vector<256x768xf32> to vector<256x128xf32>
    %8 = arith.truncf %7 : vector<256x128xf32> to vector<256x128xbf16>
    %c0_6 = arith.constant 0 : index
    %c0_7 = arith.constant 0 : index
    %c0_8 = arith.constant 0 : index
    %c0_9 = arith.constant 0 : index
    %9 = vector.load %arg5[%c0_6, %c0_7, %c0_8, %c0_9] : memref<1x2x256x128xbf16, #tpu.memory_space<vmem>>, vector<1x1x256x128xbf16>
    %10 = vector.shape_cast %9 : vector<1x1x256x128xbf16> to vector<256x128xbf16>
    %11 = vector.shape_cast %8 : vector<256x128xbf16> to vector<1x1x256x128xbf16>
    tpu.vector_store %arg5[%c0_6, %c0_7, %c0_8, %c0_9], %11 {strides = array<i32>} : memref<1x2x256x128xbf16, #tpu.memory_space<vmem>>, vector<1x1x256x128xbf16>,
    %12 = vector.extract_strided_slice %6 {offsets = [0, 256], sizes = [256, 128], strides = [1, 1]} : vector<256x768xf32> to vector<256x128xf32>
    %13 = arith.truncf %12 : vector<256x128xf32> to vector<256x128xbf16>
    %c0_10 = arith.constant 0 : index
    %c0_11 = arith.constant 0 : index
    %c0_12 = arith.constant 0 : index
    %c0_13 = arith.constant 0 : index
    %14 = vector.load %arg6[%c0_10, %c0_11, %c0_12, %c0_13] : memref<1x2x256x128xbf16, #tpu.memory_space<vmem>>, vector<1x1x256x128xbf16>
    %15 = vector.shape_cast %14 : vector<1x1x256x128xbf16> to vector<256x128xbf16>
    %16 = vector.shape_cast %13 : vector<256x128xbf16> to vector<1x1x256x128xbf16>
    tpu.vector_store %arg6[%c0_10, %c0_11, %c0_12, %c0_13], %16 {strides = array<i32>} : memref<1x2x256x128xbf16, #tpu.memory_space<vmem>>, vector<1x1x256x128xbf16>,
    %17 = vector.extract_strided_slice %6 {offsets = [0, 512], sizes = [256, 128], strides = [1, 1]} : vector<256x768xf32> to vector<256x128xf32>
    %18 = arith.truncf %17 : vector<256x128xf32> to vector<256x128xbf16>
    %c0_14 = arith.constant 0 : index
    %c0_15 = arith.constant 0 : index
    %c0_16 = arith.constant 0 : index
    %c0_17 = arith.constant 0 : index
    %19 = vector.load %arg7[%c0_14, %c0_15, %c0_16, %c0_17] : memref<1x2x256x128xbf16, #tpu.memory_space<vmem>>, vector<1x1x256x128xbf16>
    %20 = vector.shape_cast %19 : vector<1x1x256x128xbf16> to vector<256x128xbf16>
    %21 = vector.shape_cast %18 : vector<256x128xbf16> to vector<1x1x256x128xbf16>
    tpu.vector_store %arg7[%c0_14, %c0_15, %c0_16, %c0_17], %21 {strides = array<i32>} : memref<1x2x256x128xbf16, #tpu.memory_space<vmem>>, vector<1x1x256x128xbf16>,
    %22 = vector.extract_strided_slice %6 {offsets = [0, 128], sizes = [256, 128], strides = [1, 1]} : vector<256x768xf32> to vector<256x128xf32>
    %23 = arith.truncf %22 : vector<256x128xf32> to vector<256x128xbf16>
    %c0_18 = arith.constant 0 : index
    %c1 = arith.constant 1 : index
    %c0_19 = arith.constant 0 : index
    %c0_20 = arith.constant 0 : index
    %24 = vector.load %arg5[%c0_18, %c1, %c0_19, %c0_20] : memref<1x2x256x128xbf16, #tpu.memory_space<vmem>>, vector<1x1x256x128xbf16>
    %25 = vector.shape_cast %24 : vector<1x1x256x128xbf16> to vector<256x128xbf16>
    %26 = vector.shape_cast %23 : vector<256x128xbf16> to vector<1x1x256x128xbf16>
    tpu.vector_store %arg5[%c0_18, %c1, %c0_19, %c0_20], %26 {strides = array<i32>} : memref<1x2x256x128xbf16, #tpu.memory_space<vmem>>, vector<1x1x256x128xbf16>,
    %27 = vector.extract_strided_slice %6 {offsets = [0, 384], sizes = [256, 128], strides = [1, 1]} : vector<256x768xf32> to vector<256x128xf32>
    %28 = arith.truncf %27 : vector<256x128xf32> to vector<256x128xbf16>
    %c0_21 = arith.constant 0 : index
    %c1_22 = arith.constant 1 : index
    %c0_23 = arith.constant 0 : index
    %c0_24 = arith.constant 0 : index
    %29 = vector.load %arg6[%c0_21, %c1_22, %c0_23, %c0_24] : memref<1x2x256x128xbf16, #tpu.memory_space<vmem>>, vector<1x1x256x128xbf16>
    %30 = vector.shape_cast %29 : vector<1x1x256x128xbf16> to vector<256x128xbf16>
    %31 = vector.shape_cast %28 : vector<256x128xbf16> to vector<1x1x256x128xbf16>
    tpu.vector_store %arg6[%c0_21, %c1_22, %c0_23, %c0_24], %31 {strides = array<i32>} : memref<1x2x256x128xbf16, #tpu.memory_space<vmem>>, vector<1x1x256x128xbf16>,
    %32 = vector.extract_strided_slice %6 {offsets = [0, 640], sizes = [256, 128], strides = [1, 1]} : vector<256x768xf32> to vector<256x128xf32>
    %33 = arith.truncf %32 : vector<256x128xf32> to vector<256x128xbf16>
    %c0_25 = arith.constant 0 : index
    %c1_26 = arith.constant 1 : index
    %c0_27 = arith.constant 0 : index
    %c0_28 = arith.constant 0 : index
    %34 = vector.load %arg7[%c0_25, %c1_26, %c0_27, %c0_28] : memref<1x2x256x128xbf16, #tpu.memory_space<vmem>>, vector<1x1x256x128xbf16>
    %35 = vector.shape_cast %34 : vector<1x1x256x128xbf16> to vector<256x128xbf16>
    %36 = vector.shape_cast %33 : vector<256x128xbf16> to vector<1x1x256x128xbf16>
    tpu.vector_store %arg7[%c0_25, %c1_26, %c0_27, %c0_28], %36 {strides = array<i32>} : memref<1x2x256x128xbf16, #tpu.memory_space<vmem>>, vector<1x1x256x128xbf16>,
    return
  }
  func.func @transform_0(%arg0: i32, %arg1: i32) -> (i32, i32, i32) {
    %c0_i32 = arith.constant 0 : i32
    %c0_i32_0 = arith.constant 0 : i32
    return %arg0, %arg1, %c0_i32 : i32, i32, i32
  }
  func.func @transform_1(%arg0: i32, %arg1: i32) -> (i32, i32) {
    %c0_i32 = arith.constant 0 : i32
    %c0_i32_0 = arith.constant 0 : i32
    %c0_i32_1 = arith.constant 0 : i32
    return %c0_i32, %c0_i32_0 : i32, i32
  }
  func.func @transform_2(%arg0: i32, %arg1: i32) -> (i32, i32) {
    %c0_i32 = arith.constant 0 : i32
    %c0_i32_0 = arith.constant 0 : i32
    %c0_i32_1 = arith.constant 0 : i32
    return %c0_i32, %c0_i32_0 : i32, i32
  }
  func.func @transform_3(%arg0: i32, %arg1: i32) -> (i32, i32, i32, i32) {
    %c0_i32 = arith.constant 0 : i32
    %c0_i32_0 = arith.constant 0 : i32
    %c0_i32_1 = arith.constant 0 : i32
    return %arg0, %c0_i32, %arg1, %c0_i32_0 : i32, i32, i32, i32
  }
  func.func @transform_4(%arg0: i32, %arg1: i32) -> (i32, i32, i32, i32) {
    %c0_i32 = arith.constant 0 : i32
    %c0_i32_0 = arith.constant 0 : i32
    %c0_i32_1 = arith.constant 0 : i32
    return %arg0, %c0_i32, %arg1, %c0_i32_0 : i32, i32, i32, i32
  }
  func.func @transform_5(%arg0: i32, %arg1: i32) -> (i32, i32, i32, i32) {
    %c0_i32 = arith.constant 0 : i32
    %c0_i32_0 = arith.constant 0 : i32
    %c0_i32_1 = arith.constant 0 : i32
    return %arg0, %c0_i32, %arg1, %c0_i32_0 : i32, i32, i32, i32
  }
}

</mosaic_0001>

<bundles_post_ra>
// kernel: tpu_custom_call.1
= control target key start
LH: loop header
LB: loop body
LE: loop exit
PB: predicated region body
PF: predicated region fallthrough
CT: control target
= control target key end

     0   :  { %s5528_s0 = inlined_call_operand.hbm [shape: bf16[2,512,256], index: 0, kind: input, shape index: {}]   ;;  %s5529_s1 = inlined_call_operand.hbm [shape: bf16[256,768], index: 1, kind: input, shape index: {}]   ;;  %s5530_s2 = inlined_call_operand.vmem [shape: f32[1,768], index: 2, kind: input, shape index: {}]   ;;  %s5531_s3 = inlined_call_operand.hbm [shape: bf16[2,2,512,128], index: 3, kind: output, shape index: {0}]   ;;  %s5532_s4 = inlined_call_operand.hbm [shape: bf16[2,2,512,128], index: 4, kind: output, shape index: {1}]   ;;  %s5533_s5 = inlined_call_operand.hbm [shape: bf16[2,2,512,128], index: 5, kind: output, shape index: {2}]  }
   0x1   :  { %5543 = sst [smem:[#allocation26_spill]] %s5529_s1 }
   0x2   :  { %5544 = sst [smem:[#allocation27_spill]] %s5533_s5 }
   0x3   :  { %11 = vsyncpa [#allocation3], 0 }
   0x4   :  { %13 = vsyncpa [#allocation3 + $0x1], 0 }
   0x5   :  { %14 = vsyncpa [#allocation6], 0 }
   0x6   :  { %15 = vsyncpa [#allocation4], 0 }
   0x7   :  { %17 = vsyncpa [#allocation4 + $0x1], 0 }
   0x8   :  { %18 = vsyncpa [#allocation9], 0 }
   0x9   :  { %20 = vsyncpa [#allocation9 + $0x1], 0  ;;  %s4734_s18 = smov 0   ;;  %s4736_s19 = smov 0  }
   0xa   :  { %s4738_s20 = smov 0   ;;  %s4740_s21 = smov 0  }
   0xb   :  { %s4742_s22 = smov 0   ;;  %s4744_s23 = smov 0  }
   0xc   :  { %s4746_s24 = smov 0   ;;  %s4748_s25 = smov 0  }
   0xd LB: > { %5545 = sst [smem:[#allocation21_spill]] %s4647_s18  ;;  %s4775_s26 = sadd.s32 4294967295, %s4675_s25   ;;  %s4675_s25 = sphi %s4748_s25, %s26_s25   ;;  %s4671_s24 = sphi %s4746_s24, %s5575_s24   ;;  %s4667_s23 = sphi %s4744_s23, %s5569_s23   ;;  %s4663_s22 = sphi %s4742_s22, %s5574_s22   ;;  %s4659_s21 = sphi %s4740_s21, %s5568_s21   ;;  %s4655_s20 = sphi %s4738_s20, %s5573_s20   ;;  %s4651_s19 = sphi %s4736_s19, %s5572_s19   ;;  %s4647_s18 = sphi %s4734_s18, %s5571_s18  }
   0xe   : > { %5546 = sst [smem:[#allocation22_spill]] %s4667_s23  ;;  %s5537_s27 = sadd.s32 4294967294, %s4675_s25  }
   0xf   : > { %p60_p0 = scmp.ne.s32.totalorder %s4651_s19, %s4647_s18  ;;  %p5534_p1 = scmp.eq.s32.totalorder %s4775_s26, 0 }
  0x10   : > { %p134_p3 = scmp.eq.s32.totalorder %s5537_s27, 3  ;;  %p2963_p5 = scmp.ge.s32.totalorder %s4675_s25, 1 }
  0x11   : > { %p4786_p4 = por %p5534_p1, %p60_p0  ;;  %p197_p7 = scmp.lt.s32.totalorder %s4675_s25, 5 }
  0x12   : > { %p4791_p6 = por %p134_p3, %p60_p0  ;;  %s4677_s6 = smov [#allocation5]  }
  0x13   : > { %s5547_s28 = scalar_select %p4786_p4, 1, 0 }
  0x14   : > { %s5548_s29 = scalar_select %p4791_p6, 1, 0 }
  0x15   : > { %p4796_p8 = pnand %p2963_p5, %p197_p7  ;;  %s209_s7 = sshll.u32 %s4677_s6, 4  ;;  %s210_s7 = int_to_ptr.vmem [resolvable:$true] %s209_s7 }
  0x16   : > { %5549 = sst [smem:[#allocation23_spill]] %s5548_s29  ;;  %s5552_s1 = sld [smem:[#allocation26_spill]] }
  0x17   : > { %s5550_s30 = scalar_select %p4796_p8, 1, 0 }
  0x18   : > { %p4235_p9 = pneg %p4796_p8 }
  0x1a   : > { %p4804_p10 = pnand %p4235_p9, %p5534_p1 }
  0x1c   : > { %s4539_s11 = scalar_lea.hbm %s5552_s1, 12288  ;;  %p4541_p12 = pneg %p4804_p10 }
  0x1d   : > { %p4540_p11 = scmp.ne.s32.totalorder %s5552_s1, %s4539_s11  ;;  %p4546_p3 = scmp.lt.u32.totalorder %s4539_s11, %s5552_s1 }
  0x1f   : > { %p4542_p13 = pnand %p4541_p12, %p4540_p11 }
  0x21   : > { %p4543_p0 = pneg %p4542_p13 }
  0x23   : > { %p4548_p5 = pnand %p4546_p3, %p4543_p0 }
  0x25   : > { %4551 = shalt.err (!%p4548_p5)
}
  0x26   : > { %s4552_s16 = scalar_lea.vmem %s210_s7, 12288  ;;  %p4560_p2 = scmp.lt.s32.totalorder %s210_s7, %s210_s7 }
  0x27   : > { %p4553_p7 = scmp.ne.s32.totalorder %s210_s7, %s4552_s16  ;;  %p4561_p6 = scmp.lt.s32.totalorder %s4552_s16, %s4552_s16 }
  0x29   : > { %p4555_p9 = pnand %p4553_p7, %p4541_p12  ;;  %p4562_p4 = por %p4561_p6, %p4560_p2 }
  0x2b   : > { %p4556_p1 = pneg %p4555_p9 }
  0x2d   : > { %p4563_p8 = pnand %p4562_p4, %p4556_p1 }
  0x2f   : > { %4566 = shalt.err (!%p4563_p8)
}
  0x30   : > { %s4678_s17 = smov 384   ;;  %s4679_s6 = smov 24  }
  0x31   : > { %4238 = dma.hbm_to_vmem [thread:$0]  (!%p4804_p10), %s5552_s1, 12288, %s210_s7, [#allocation6], %s4678_s17, %s4678_s17, %s4679_s6  }
  0x32   : > { %s35_s11 = sadd.s32 1, %s4667_s23  ;;  %s38_s12 = sadd.s32 1, %s4671_s24 }
  0x33   : > { %p36_p1 = scmp.ge.s32.totalorder %s35_s11, 2  ;;  %s47_s13 = sadd.s32 1, %s4655_s20 }
  0x34   : > { %p54_p2 = scmp.ne.s32.totalorder %s4655_s20, %s4651_s19  ;;  %p55_p4 = scmp.eq.s32.totalorder %s4675_s25, 0 }
  0x35   : > { %s5577_s11 = smov (%p36_p1, %s35_s11), 0  ;;  %s5579_s12 = smov (!%p36_p1, %s38_s12), %s4671_s24 }
  0x36   : > { %5553 = sst [smem:[#allocation24_spill]] %s5577_s11  ;;  %s43_s14 = ssub.s32 %s4667_s23, %s5577_s11 }
  0x37   : > { %p40_p6 = scmp.ge.s32.totalorder %s5579_s12, 2  ;;  %p5554_p8 = scmp.eq.s32.totalorder %s4775_s26, 3 }
  0x38   : > { %p4841_p10 = por %p55_p4, %p54_p2  ;;  %p4254_p12 = scmp.lt.s32.totalorder %s4675_s25, 4 }
  0x39   : > { %p4837_p11 = por %p5554_p8, %p54_p2  ;;  %s5581_s12 = smov (%p40_p6, %s5579_s12), 0 }
  0x3a   : > { %5557 = sst [smem:[#allocation25_spill]] %s5581_s12  ;;  %s226_s15 = sand.u32 1, %s4655_s20  }
  0x3b   : > { %s3407_s16 = sshll.u32 %s4667_s23, 6  ;;  %s42_s17 = ssub.s32 %s4671_s24, %s5581_s12 }
  0x3c   : > { %s44_s6 = sor.u32 %s43_s14, %s42_s17  ;;  %s2966_s9 = sshll.u32 %s226_s15, 8 }
  0x3d   : > { %p45_p13 = scmp.eq.s32.totalorder %s44_s6, 0  ;;  %s2969_s10 = sshll.u32 %s4671_s24, 7 }
  0x3e   : > { %s230_s27 = scalar_lea.vmem [#allocation2], %s2966_s9  ;;  %s237_s29 = sadd.s32 %s3407_s16, %s2969_s10 }
  0x3f   : > { %s240_s1 = sshll.u32 %s230_s27, 4  ;;  %s2970_s18 = sshll.u32 %s237_s29, 6  ;;  %s4856_s1 = int_to_ptr.vmem [resolvable:$true] %s240_s1 }
  0x40   : > { %s4854_s11 = scalar_select %p45_p13, %s4655_s20, %s47_s13  }
  0x41   : > { %p4862_p0 = pnand %p4254_p12, %p4841_p10  ;;  %s4869_s14 = scalar_lea.hbm %s5528_s0, %s2970_s18 }
  0x42   : > { %s4871_s27 = scalar_lea.sflag [#allocation3], %s226_s15  ;;  %s4567_s29 = scalar_lea.hbm %s4869_s14, 4096 }
  0x43   : > { %p4568_p3 = scmp.ne.s32.totalorder %s4869_s14, %s4567_s29  ;;  %p4569_p5 = pneg %p4862_p0 }
  0x44   : > { %s4572_s12 = scalar_lea.hbm %s5528_s0, 16384  ;;  %p4573_p1 = scmp.lt.u32.totalorder %s4869_s14, %s5528_s0 }
  0x45   : > { %p4570_p7 = pnand %p4569_p5, %p4568_p3  ;;  %p4574_p2 = scmp.lt.u32.totalorder %s4572_s12, %s4567_s29 }
  0x46   : > { %p4576_p6 = scmp.lt.u32.totalorder %s4567_s29, %s4869_s14 }
  0x47   : > { %p4571_p9 = pneg %p4570_p7  ;;  %p4575_p4 = por %p4574_p2, %p4573_p1 }
  0x49   : > { %p4577_p8 = por %p4576_p6, %p4575_p4 }
  0x4b   : > { %p4578_p10 = pnand %p4577_p8, %p4571_p9 }
  0x4d   : > { %4581 = shalt.err (!%p4578_p10)
}
  0x4e   : > { %s4582_s15 = scalar_lea.vmem %s4856_s1, 4096  ;;  %s4680_s16 = smov [#allocation2]  }
  0x4f   : > { %p4583_p12 = scmp.ne.s32.totalorder %s4856_s1, %s4582_s15  ;;  %s4587_s17 = sshll.u32 %s4680_s16, 4  ;;  %s4588_s17 = int_to_ptr.vmem [resolvable:$false] %s4587_s17 }
  0x50   : > { %s4589_s6 = scalar_lea.vmem %s4588_s17, 8192  ;;  %p4590_p7 = scmp.lt.s32.totalorder %s4856_s1, %s4588_s17 }
  0x51   : > { %p4585_p13 = pnand %p4583_p12, %p4569_p5  ;;  %p4591_p1 = scmp.lt.s32.totalorder %s4589_s6, %s4582_s15 }
  0x53   : > { %p4586_p3 = pneg %p4585_p13  ;;  %p4592_p2 = por %p4591_p1, %p4590_p7 }
  0x55   : > { %p4593_p4 = pnand %p4592_p2, %p4586_p3 }
  0x57   : > { %4596 = shalt.err (!%p4593_p4)
}
  0x58   : > { %s4681_s9 = smov 128   ;;  %s4682_s10 = smov 8  }
  0x59   : > { %4242 = dma.hbm_to_vmem [thread:$0]  (!%p4862_p0), %s4869_s14, 4096, %s4856_s1, %s4871_s27, %s4681_s9, %s4681_s9, %s4682_s10  }
  0x5a   : > { %p5559_p5 = scmp.ne.s32.totalorder %s5550_s30, 0 }
  0x5b   : > { %s4902_s29 = sand.u32 (!%p5559_p5), 1, %s4651_s19   ;;  %p5560_p9 = scmp.ne.s32.totalorder (!%p5559_p5), %s5547_s28, 0 }
  0x5c   : > { %252 = sbr.rel (%p5559_p5) target bundleno = 601 (0x259), region = 32  ;;  %s4905_s13 = sshll.u32 (!%p5559_p5), %s4902_s29, 8 }
  0x5d   : > { %s255_s23 = scalar_lea.sflag (!%p5559_p5), [#allocation3], %s4902_s29  ;;  %s4909_s12 = scalar_lea.vmem (!%p5559_p5), [#allocation2], %s4905_s13 }
  0x63   : > { %4630 = dma.done.wait (%p5560_p9), %s255_s23, 4096  }
  0x64   : > { %4632 = vsyncadd (%p5560_p9), %s255_s23, 4294963200  ;;  %p5561_p0 = scmp.eq.s32.totalorder %s4775_s26, 0 }
  0x66   : > { %4634 = dma.done.wait (%p5561_p0), [#allocation6], 12288   ;;  %p5562_p6 = pmov %p5561_p0 }
  0x67   : > { %v4347_v0 = vld [vmem:[#allocation5 + $0x4] ss:$24 sps:$4 sm:$0xff]   ;;  %v4349_v1 = vld [vmem:[#allocation5] ss:$24 sps:$4 sm:$0xff]   ;;  %v4350_v2 = vld [vmem:[#allocation5 + $0x34] ss:$24 sps:$4 sm:$0xff]  }
  0x68   : > { %4636 = vsyncadd (%p5562_p6), [#allocation6], 4294955008  ;;  %1103 = vmatprep.subr.bf16.mxu0 %v4347_v0  ;;  %4173 = vmatprep.subr.bf16.mxu1 %v4347_v0  ;;  %v4352_v3 = vld [vmem:[#allocation5 + $0x30] ss:$24 sps:$4 sm:$0xff]   ;;  %v4353_v4 = vld [vmem:[#allocation5 + $0x64] ss:$24 sps:$4 sm:$0xff]  }
  0x69   : > { %1104 = vmatpush1.bf16.msra.mxu0 %v4349_v1  ;;  %4189 = vmatpush1.bf16.msra.mxu1 %v4349_v1  ;;  %v4355_v5 = vld [vmem:[#allocation5 + $0x60] ss:$24 sps:$4 sm:$0xff]   ;;  %v4356_v6 = vld [vmem:[#allocation5 + $0x94] ss:$24 sps:$4 sm:$0xff]   ;;  %v4358_v7 = vld [vmem:[#allocation5 + $0x90] ss:$24 sps:$4 sm:$0xff]  }
  0x6a   : > { %1105 = vmatprep.subr.bf16.mxu0 %v4350_v2  ;;  %4174 = vmatprep.subr.bf16.mxu1 %v4350_v2  ;;  %v4359_v8 = vld [vmem:[#allocation5 + $0xc4] ss:$24 sps:$4 sm:$0xff]   ;;  %v4361_v9 = vld [vmem:[#allocation5 + $0xc0] ss:$24 sps:$4 sm:$0xff]   ;;  %v4362_v10 = vld [vmem:[#allocation5 + $0xf4] ss:$24 sps:$4 sm:$0xff]  }
  0x6b   : > { %v4364_v11 = vld [vmem:[#allocation5 + $0xf0] ss:$24 sps:$4 sm:$0xff]   ;;  %v4365_v12 = vld [vmem:[#allocation5 + $0x124] ss:$24 sps:$4 sm:$0xff]   ;;  %v4367_v14 = vld [vmem:[#allocation5 + $0x120] ss:$24 sps:$4 sm:$0xff]  }
  0x6c   : > { %v4920_v13 = vld [vmem:[%s4909_s12 + $0x4] ss:$8 sps:$4 sm:$0xff]   ;;  %v4370_v17 = vld [vmem:[#allocation5 + $0x150] ss:$24 sps:$4 sm:$0xff]   ;;  %v4373_v19 = vld [vmem:[#allocation5 + $0x180] ss:$24 sps:$4 sm:$0xff]  }
  0x6d   : > { %1106 = vmatpush1.bf16.msra.mxu0 %v4352_v3  ;;  %4190 = vmatpush1.bf16.msra.mxu1 %v4352_v3  ;;  %v4923_v15 = vld [vmem:[%s4909_s12 + $0x84] ss:$8 sps:$4 sm:$0xff]   ;;  %v4376_v21 = vld [vmem:[#allocation5 + $0x1b0] ss:$24 sps:$4 sm:$0xff]   ;;  %v4379_v23 = vld [vmem:[#allocation5 + $0x1e0] ss:$24 sps:$4 sm:$0xff]  }
  0x6e   : > { %1107 = vmatprep.subr.bf16.mxu0 %v4353_v4  ;;  %4175 = vmatprep.subr.bf16.mxu1 %v4353_v4  ;;  %v4368_v16 = vld [vmem:[#allocation5 + $0x154] ss:$24 sps:$4 sm:$0xff]   ;;  %v4371_v18 = vld [vmem:[#allocation5 + $0x184] ss:$24 sps:$4 sm:$0xff]   ;;  %v4382_v25 = vld [vmem:[#allocation5 + $0x210] ss:$24 sps:$4 sm:$0xff]  }
  0x6f   : > { %1135 = vmatprep.mubr.bf16.mxu0 %v4920_v13  ;;  %1215 = vmatprep.mubr.bf16.mxu1 %v4923_v15  ;;  %v4374_v20 = vld [vmem:[#allocation5 + $0x1b4] ss:$24 sps:$4 sm:$0xff]   ;;  %v4377_v22 = vld [vmem:[#allocation5 + $0x1e4] ss:$24 sps:$4 sm:$0xff]   ;;  %v4385_v27 = vld [vmem:[#allocation5 + $0x240] ss:$24 sps:$4 sm:$0xff]  }
  0x70   : > { %v4380_v24 = vld [vmem:[#allocation5 + $0x214] ss:$24 sps:$4 sm:$0xff]   ;;  %v4383_v26 = vld [vmem:[#allocation5 + $0x244] ss:$24 sps:$4 sm:$0xff]   ;;  %v4388_v29 = vld [vmem:[#allocation5 + $0x270] ss:$24 sps:$4 sm:$0xff]  }
  0x71   : > { %1108 = vmatpush1.bf16.msra.mxu0 %v4355_v5  ;;  %4191 = vmatpush1.bf16.msra.mxu1 %v4355_v5  ;;  %v4386_v28 = vld [vmem:[#allocation5 + $0x274] ss:$24 sps:$4 sm:$0xff]   ;;  %v4389_v30 = vld [vmem:[#allocation5 + $0x2a4] ss:$24 sps:$4 sm:$0xff]   ;;  %v4391_v31 = vld [vmem:[#allocation5 + $0x2a0] ss:$24 sps:$4 sm:$0xff]  }
  0x72   : > { %1109 = vmatprep.subr.bf16.mxu0 %v4356_v6  ;;  %4176 = vmatprep.subr.bf16.mxu1 %v4356_v6  ;;  %v4392_v32 = vld [vmem:[#allocation5 + $0x2d4] ss:$24 sps:$4 sm:$0xff]   ;;  %v4394_v33 = vld [vmem:[#allocation5 + $0x2d0] ss:$24 sps:$4 sm:$0xff]   ;;  %v4412_v41 = vld [vmem:[#allocation5 + $0x44] ss:$24 sps:$4 sm:$0xff]  }
  0x73   : > { %v4403_v34 = vld [vmem:[#allocation5 + $0xc] ss:$24 sps:$4 sm:$0xff]   ;;  %v4928_v35 = vld [vmem:[%s4909_s12] ss:$8 sps:$4 sm:$0xff]   ;;  %v4409_v40 = vld [vmem:[#allocation5 + $0x3c] ss:$24 sps:$4 sm:$0xff]  }
  0x74   : > { %v4406_v36 = vld [vmem:[#allocation5 + $0x14] ss:$24 sps:$4 sm:$0xff]   ;;  %v4931_v37 = vld [vmem:[%s4909_s12 + $0x80] ss:$8 sps:$4 sm:$0xff]   ;;  %v4407_v44 = vld [vmem:[#allocation5 + $0x38] ss:$24 sps:$4 sm:$0xff]  }
  0x75   : > { %1110 = vmatpush1.bf16.msra.mxu0 %v4358_v7  ;;  %4192 = vmatpush1.bf16.msra.mxu1 %v4358_v7  ;;  %v4401_v38 = vld [vmem:[#allocation5 + $0x8] ss:$24 sps:$4 sm:$0xff]   ;;  %v4934_v42 = vld [vmem:[%s4909_s12 + $0x14] ss:$8 sps:$4 sm:$0xff]   ;;  %v4421_v46 = vld [vmem:[#allocation5 + $0x6c] ss:$24 sps:$4 sm:$0xff]  }
  0x76   : > { %1111 = vmatprep.subr.bf16.mxu0 %v4359_v8  ;;  %4177 = vmatprep.subr.bf16.mxu1 %v4359_v8  ;;  %v4404_v39 = vld [vmem:[#allocation5 + $0x10] ss:$24 sps:$4 sm:$0xff]   ;;  %v4937_v43 = vld [vmem:[%s4909_s12 + $0x94] ss:$8 sps:$4 sm:$0xff]   ;;  %v4410_v45 = vld [vmem:[#allocation5 + $0x40] ss:$24 sps:$4 sm:$0xff]  }
  0x77   : > { %v4942_v47 = vld [vmem:[%s4909_s12 + $0x10] ss:$8 sps:$4 sm:$0xff]   ;;  %v4424_v48 = vld [vmem:[#allocation5 + $0x74] ss:$24 sps:$4 sm:$0xff]   ;;  %v4419_v50 = vld [vmem:[#allocation5 + $0x68] ss:$24 sps:$4 sm:$0xff]  }
  0x78   : > { %v4947_v49 = vld [vmem:[%s4909_s12 + $0x90] ss:$8 sps:$4 sm:$0xff]   ;;  %v4427_v52 = vld [vmem:[#allocation5 + $0x9c] ss:$24 sps:$4 sm:$0xff]   ;;  %v4950_v54 = vld [vmem:[%s4909_s12 + $0x24] ss:$8 sps:$4 sm:$0xff]  }
  0x79   : > { %1112 = vmatpush1.bf16.msra.mxu0 %v4361_v9  ;;  %4193 = vmatpush1.bf16.msra.mxu1 %v4361_v9  ;;  %v4422_v51 = vld [vmem:[#allocation5 + $0x70] ss:$24 sps:$4 sm:$0xff]   ;;  %v4430_v53 = vld [vmem:[#allocation5 + $0xa4] ss:$24 sps:$4 sm:$0xff]   ;;  %v4428_v57 = vld [vmem:[#allocation5 + $0xa0] ss:$24 sps:$4 sm:$0xff]  }
  0x7a   : > { %1113 = vmatprep.subr.bf16.mxu0 %v4362_v10  ;;  %4178 = vmatprep.subr.bf16.mxu1 %v4362_v10  ;;  %v4953_v55 = vld [vmem:[%s4909_s12 + $0xa4] ss:$8 sps:$4 sm:$0xff]   ;;  %v4425_v56 = vld [vmem:[#allocation5 + $0x98] ss:$24 sps:$4 sm:$0xff]   ;;  %v4958_v59 = vld [vmem:[%s4909_s12 + $0x20] ss:$8 sps:$4 sm:$0xff]  }
  0x7b   : > { %v4439_v58 = vld [vmem:[#allocation5 + $0xcc] ss:$24 sps:$4 sm:$0xff]   ;;  %v4963_v61 = vld [vmem:[%s4909_s12 + $0xa0] ss:$8 sps:$4 sm:$0xff]   ;;  %v4445_v0 = vld [vmem:[#allocation5 + $0xfc] ss:$24 sps:$4 sm:$0xff]  }
  0x7c   : > { %v4442_v60 = vld [vmem:[#allocation5 + $0xd4] ss:$24 sps:$4 sm:$0xff]   ;;  %v4437_v62 = vld [vmem:[#allocation5 + $0xc8] ss:$24 sps:$4 sm:$0xff]   ;;  %v4448_v1 = vld [vmem:[#allocation5 + $0x104] ss:$24 sps:$4 sm:$0xff]  }
  0x7d   : > { %1114 = vmatpush1.bf16.msra.mxu0 %v4364_v11  ;;  %4194 = vmatpush1.bf16.msra.mxu1 %v4364_v11  ;;  %v4440_v63 = vld [vmem:[#allocation5 + $0xd0] ss:$24 sps:$4 sm:$0xff]   ;;  %v4966_v2 = vld [vmem:[%s4909_s12 + $0x34] ss:$8 sps:$4 sm:$0xff]   ;;  %v4446_v5 = vld [vmem:[#allocation5 + $0x100] ss:$24 sps:$4 sm:$0xff]  }
  0x7e   : > { %1115 = vmatprep.subr.bf16.mxu0 %v4365_v12  ;;  %4179 = vmatprep.subr.bf16.mxu1 %v4365_v12  ;;  %v4969_v3 = vld [vmem:[%s4909_s12 + $0xb4] ss:$8 sps:$4 sm:$0xff]   ;;  %v4443_v4 = vld [vmem:[#allocation5 + $0xf8] ss:$24 sps:$4 sm:$0xff]   ;;  %v4457_v6 = vld [vmem:[#allocation5 + $0x12c] ss:$24 sps:$4 sm:$0xff]  }
  0x7f   : > { %v4460_v7 = vld [vmem:[#allocation5 + $0x134] ss:$24 sps:$4 sm:$0xff]   ;;  %v4976_v8 = vld [vmem:[%s4909_s12 + $0x30] ss:$8 sps:$4 sm:$0xff]   ;;  %v4455_v10 = vld [vmem:[#allocation5 + $0x128] ss:$24 sps:$4 sm:$0xff]  }
  0x80   : > { %v4979_v9 = vld [vmem:[%s4909_s12 + $0xb0] ss:$8 sps:$4 sm:$0xff]   ;;  %v4463_v12 = vld [vmem:[#allocation5 + $0x15c] ss:$24 sps:$4 sm:$0xff]   ;;  %s5125_s28 = scalar_lea.vmem [#allocation7], %s4905_s13  ;;  %s2650_s30 = sand.u32 1, %s4775_s26  }
  0x81   : > { %1116 = vmatpush1.bf16.msra.mxu0 %v4367_v14  ;;  %4195 = vmatpush1.bf16.msra.mxu1 %v4367_v14  ;;  %v4458_v11 = vld [vmem:[#allocation5 + $0x130] ss:$24 sps:$4 sm:$0xff]   ;;  %v4466_v14 = vld [vmem:[#allocation5 + $0x164] ss:$24 sps:$4 sm:$0xff]   ;;  %s5241_s14 = scalar_lea.vmem [#allocation8], %s4905_s13  ;;  %s5245_s27 = scalar_lea.vmem [#allocation10], %s4905_s13 }
  0x82   : > { %1117 = vmatprep.subr.bf16.mxu0 %v4368_v16  ;;  %4180 = vmatprep.subr.bf16.mxu1 %v4368_v16  ;;  %v4982_v16 = vld [vmem:[%s4909_s12 + $0x44] ss:$8 sps:$4 sm:$0xff]   ;;  %s2646_s18 = scalar_lea.sflag [#allocation4], %s4902_s29  ;;  %s5433_s7 = scalar_lea.sflag [#allocation9], %s2650_s30 }
  0x85   : > { %1118 = vmatpush1.bf16.msra.mxu0 %v4370_v17  ;;  %4196 = vmatpush1.bf16.msra.mxu1 %v4370_v17  ;;  %v4985_v17 = vld [vmem:[%s4909_s12 + $0xc4] ss:$8 sps:$4 sm:$0xff]  }
  0x86   : > { %1119 = vmatprep.subr.bf16.mxu0 %v4371_v18  ;;  %4181 = vmatprep.subr.bf16.mxu1 %v4371_v18  ;;  %v4461_v18 = vld [vmem:[#allocation5 + $0x158] ss:$24 sps:$4 sm:$0xff]  }
  0x89   : > { %1120 = vmatpush1.bf16.msra.mxu0 %v4373_v19  ;;  %4197 = vmatpush1.bf16.msra.mxu1 %v4373_v19  ;;  %v4464_v19 = vld [vmem:[#allocation5 + $0x160] ss:$24 sps:$4 sm:$0xff]  }
  0x8a   : > { %1121 = vmatprep.subr.bf16.mxu0 %v4374_v20  ;;  %4182 = vmatprep.subr.bf16.mxu1 %v4374_v20  ;;  %v4475_v20 = vld [vmem:[#allocation5 + $0x18c] ss:$24 sps:$4 sm:$0xff]  }
  0x8d   : > { %1122 = vmatpush1.bf16.msra.mxu0 %v4376_v21  ;;  %4198 = vmatpush1.bf16.msra.mxu1 %v4376_v21  ;;  %v4478_v21 = vld [vmem:[#allocation5 + $0x194] ss:$24 sps:$4 sm:$0xff]  }
  0x8e   : > { %1123 = vmatprep.subr.bf16.mxu0 %v4377_v22  ;;  %4183 = vmatprep.subr.bf16.mxu1 %v4377_v22  ;;  %v4992_v22 = vld [vmem:[%s4909_s12 + $0x40] ss:$8 sps:$4 sm:$0xff]  }
  0x91   : > { %1124 = vmatpush1.bf16.msra.mxu0 %v4379_v23  ;;  %4199 = vmatpush1.bf16.msra.mxu1 %v4379_v23  ;;  %v4995_v23 = vld [vmem:[%s4909_s12 + $0xc0] ss:$8 sps:$4 sm:$0xff]  }
  0x92   : > { %1125 = vmatprep.subr.bf16.mxu0 %v4380_v24  ;;  %4184 = vmatprep.subr.bf16.mxu1 %v4380_v24  ;;  %v4473_v24 = vld [vmem:[#allocation5 + $0x188] ss:$24 sps:$4 sm:$0xff]  }
  0x95   : > { %1126 = vmatpush1.bf16.msra.mxu0 %v4382_v25  ;;  %4200 = vmatpush1.bf16.msra.mxu1 %v4382_v25  ;;  %v4476_v25 = vld [vmem:[#allocation5 + $0x190] ss:$24 sps:$4 sm:$0xff]  }
  0x96   : > { %1127 = vmatprep.subr.bf16.mxu0 %v4383_v26  ;;  %4185 = vmatprep.subr.bf16.mxu1 %v4383_v26  ;;  %v4481_v26 = vld [vmem:[#allocation5 + $0x1bc] ss:$24 sps:$4 sm:$0xff]  }
  0x99   : > { %1128 = vmatpush1.bf16.msra.mxu0 %v4385_v27  ;;  %4201 = vmatpush1.bf16.msra.mxu1 %v4385_v27  ;;  %v4484_v27 = vld [vmem:[#allocation5 + $0x1c4] ss:$24 sps:$4 sm:$0xff]  }
  0x9a   : > { %1129 = vmatprep.subr.bf16.mxu0 %v4386_v28  ;;  %4186 = vmatprep.subr.bf16.mxu1 %v4386_v28  ;;  %v4998_v28 = vld [vmem:[%s4909_s12 + $0x54] ss:$8 sps:$4 sm:$0xff]  }
  0x9d   : > { %1130 = vmatpush1.bf16.msra.mxu0 %v4388_v29  ;;  %4202 = vmatpush1.bf16.msra.mxu1 %v4388_v29  ;;  %v5001_v29 = vld [vmem:[%s4909_s12 + $0xd4] ss:$8 sps:$4 sm:$0xff]  }
  0x9e   : > { %1131 = vmatprep.subr.bf16.mxu0 %v4389_v30  ;;  %4187 = vmatprep.subr.bf16.mxu1 %v4389_v30  ;;  %v4479_v30 = vld [vmem:[#allocation5 + $0x1b8] ss:$24 sps:$4 sm:$0xff]  }
  0xa1   : > { %1132 = vmatpush1.bf16.msra.mxu0 %v4391_v31  ;;  %4203 = vmatpush1.bf16.msra.mxu1 %v4391_v31  ;;  %v4482_v31 = vld [vmem:[#allocation5 + $0x1c0] ss:$24 sps:$4 sm:$0xff]  }
  0xa2   : > { %1133 = vmatprep.subr.bf16.mxu0 %v4392_v32  ;;  %4188 = vmatprep.subr.bf16.mxu1 %v4392_v32  ;;  %v4493_v32 = vld [vmem:[#allocation5 + $0x1ec] ss:$24 sps:$4 sm:$0xff]  }
  0xa5   : > { %1134 = vmatpush1.bf16.msra.mxu0 %v4394_v33  ;;  %4204 = vmatpush1.bf16.msra.mxu1 %v4394_v33  ;;  %v4496_v33 = vld [vmem:[#allocation5 + $0x1f4] ss:$24 sps:$4 sm:$0xff]  }
  0xa6   : > { %1296 = vmatprep.subr.bf16.mxu1 %v4403_v34  ;;  %1489 = vmatprep.subr.bf16.mxu0 %v4406_v36  ;;  %v5008_v34 = vld [vmem:[%s4909_s12 + $0x50] ss:$8 sps:$4 sm:$0xff]  }
  0xa7   : > { %v5011_v36 = vld [vmem:[%s4909_s12 + $0xd0] ss:$8 sps:$4 sm:$0xff]  }
  0xa8   : > { %1136 = vmatmul.mubr.bf16.vlgmr.msra.gmra.mrb[0].mxu0 %v4928_v35  ;;  %1216 = vmatmul.mubr.bf16.vlgmr.msra.gmra.mrb[0].mxu1 %v4931_v37 }
  0xa9   : > { %1297 = vmatpush1.bf16.msra.mxu1 %v4401_v38  ;;  %1490 = vmatpush1.bf16.msra.mxu0 %v4404_v39  ;;  %v4491_v38 = vld [vmem:[#allocation5 + $0x1e8] ss:$24 sps:$4 sm:$0xff]  }
  0xaa   : > { %1298 = vmatprep.subr.bf16.mxu1 %v4409_v40  ;;  %1491 = vmatprep.subr.bf16.mxu0 %v4412_v41  ;;  %v4494_v39 = vld [vmem:[#allocation5 + $0x1f0] ss:$24 sps:$4 sm:$0xff]   ;;  %v4499_v40 = vld [vmem:[#allocation5 + $0x21c] ss:$24 sps:$4 sm:$0xff]  }
  0xab   : > { %1145 = vmatprep.mubr.bf16.mxu0 %v4934_v42  ;;  %1225 = vmatprep.mubr.bf16.mxu1 %v4937_v43  ;;  %v4502_v41 = vld [vmem:[#allocation5 + $0x224] ss:$24 sps:$4 sm:$0xff]  }
  0xad   : > { %1299 = vmatpush1.bf16.msra.mxu1 %v4407_v44  ;;  %1492 = vmatpush1.bf16.msra.mxu0 %v4410_v45  ;;  %v5014_v44 = vld [vmem:[%s4909_s12 + $0x64] ss:$8 sps:$4 sm:$0xff]  }
  0xae   : > { %1300 = vmatprep.subr.bf16.mxu1 %v4421_v46  ;;  %1493 = vmatprep.subr.bf16.mxu0 %v4424_v48  ;;  %v5017_v45 = vld [vmem:[%s4909_s12 + $0xe4] ss:$8 sps:$4 sm:$0xff]   ;;  %v4497_v46 = vld [vmem:[#allocation5 + $0x218] ss:$24 sps:$4 sm:$0xff]  }
  0xaf   : > { %v4500_v48 = vld [vmem:[#allocation5 + $0x220] ss:$24 sps:$4 sm:$0xff]  }
  0xb0   : > { %1146 = vmatmul.mubr.bf16.gmra.mrb[4].mxu0 %v4942_v47  ;;  %1226 = vmatmul.mubr.bf16.gmra.mrb[4].mxu1 %v4947_v49 }
  0xb1   : > { %1301 = vmatpush1.bf16.msra.mxu1 %v4419_v50  ;;  %1494 = vmatpush1.bf16.msra.mxu0 %v4422_v51  ;;  %v4511_v50 = vld [vmem:[#allocation5 + $0x24c] ss:$24 sps:$4 sm:$0xff]  }
  0xb2   : > { %1302 = vmatprep.subr.bf16.mxu1 %v4427_v52  ;;  %1495 = vmatprep.subr.bf16.mxu0 %v4430_v53  ;;  %v4514_v51 = vld [vmem:[#allocation5 + $0x254] ss:$24 sps:$4 sm:$0xff]   ;;  %v5024_v52 = vld [vmem:[%s4909_s12 + $0x60] ss:$8 sps:$4 sm:$0xff]  }
  0xb3   : > { %1155 = vmatprep.mubr.bf16.mxu0 %v4950_v54  ;;  %1235 = vmatprep.mubr.bf16.mxu1 %v4953_v55  ;;  %v5027_v53 = vld [vmem:[%s4909_s12 + $0xe0] ss:$8 sps:$4 sm:$0xff]  }
  0xb5   : > { %1303 = vmatpush1.bf16.msra.mxu1 %v4425_v56  ;;  %1496 = vmatpush1.bf16.msra.mxu0 %v4428_v57  ;;  %v4509_v56 = vld [vmem:[#allocation5 + $0x248] ss:$24 sps:$4 sm:$0xff]  }
  0xb6   : > { %1304 = vmatprep.subr.bf16.mxu1 %v4439_v58  ;;  %1497 = vmatprep.subr.bf16.mxu0 %v4442_v60  ;;  %v4512_v57 = vld [vmem:[#allocation5 + $0x250] ss:$24 sps:$4 sm:$0xff]   ;;  %v4517_v58 = vld [vmem:[#allocation5 + $0x27c] ss:$24 sps:$4 sm:$0xff]  }
  0xb7   : > { %v4520_v60 = vld [vmem:[#allocation5 + $0x284] ss:$24 sps:$4 sm:$0xff]  }
  0xb8   : > { %1156 = vmatmul.mubr.bf16.gmra.mrb[8].mxu0 %v4958_v59  ;;  %1236 = vmatmul.mubr.bf16.gmra.mrb[8].mxu1 %v4963_v61 }
  0xb9   : > { %1305 = vmatpush1.bf16.msra.mxu1 %v4437_v62  ;;  %1498 = vmatpush1.bf16.msra.mxu0 %v4440_v63  ;;  %v4521_v62 = vld [vmem:[%s4909_s12 + $0x74] ss:$8 sps:$4 sm:$0xff]  }
  0xba   : > { %1306 = vmatprep.subr.bf16.mxu1 %v4445_v0  ;;  %1499 = vmatprep.subr.bf16.mxu0 %v4448_v1  ;;  %v5031_v63 = vld [vmem:[%s4909_s12 + $0xf4] ss:$8 sps:$4 sm:$0xff]   ;;  %v4515_v0 = vld [vmem:[#allocation5 + $0x278] ss:$24 sps:$4 sm:$0xff]  }
  0xbb   : > { %1165 = vmatprep.mubr.bf16.mxu0 %v4966_v2  ;;  %1245 = vmatprep.mubr.bf16.mxu1 %v4969_v3  ;;  %v4518_v1 = vld [vmem:[#allocation5 + $0x280] ss:$24 sps:$4 sm:$0xff]  }
  0xbd   : > { %1307 = vmatpush1.bf16.msra.mxu1 %v4443_v4  ;;  %1500 = vmatpush1.bf16.msra.mxu0 %v4446_v5  ;;  %v4529_v4 = vld [vmem:[#allocation5 + $0x2ac] ss:$24 sps:$4 sm:$0xff]  }
  0xbe   : > { %1308 = vmatprep.subr.bf16.mxu1 %v4457_v6  ;;  %1501 = vmatprep.subr.bf16.mxu0 %v4460_v7  ;;  %v4532_v5 = vld [vmem:[#allocation5 + $0x2b4] ss:$24 sps:$4 sm:$0xff]   ;;  %v4525_v6 = vld [vmem:[%s4909_s12 + $0x70] ss:$8 sps:$4 sm:$0xff]  }
  0xbf   : > { %v5038_v7 = vld [vmem:[%s4909_s12 + $0xf0] ss:$8 sps:$4 sm:$0xff]  }
  0xc0   : > { %1166 = vmatmul.mubr.bf16.gmra.mrb[12].mxu0 %v4976_v8  ;;  %1246 = vmatmul.mubr.bf16.gmra.mrb[12].mxu1 %v4979_v9 }
  0xc1   : > { %1309 = vmatpush1.bf16.msra.mxu1 %v4455_v10  ;;  %1502 = vmatpush1.bf16.msra.mxu0 %v4458_v11  ;;  %v4527_v10 = vld [vmem:[#allocation5 + $0x2a8] ss:$24 sps:$4 sm:$0xff]  }
  0xc2   : > { %1310 = vmatprep.subr.bf16.mxu1 %v4463_v12  ;;  %1503 = vmatprep.subr.bf16.mxu0 %v4466_v14  ;;  %v4530_v11 = vld [vmem:[#allocation5 + $0x2b0] ss:$24 sps:$4 sm:$0xff]   ;;  %v4535_v12 = vld [vmem:[#allocation5 + $0x2dc] ss:$24 sps:$4 sm:$0xff]  }
  0xc3   : > { %1175 = vmatprep.mubr.bf16.mxu0 %v4982_v16  ;;  %1255 = vmatprep.mubr.bf16.mxu1 %v4985_v17  ;;  %v4538_v14 = vld [vmem:[#allocation5 + $0x2e4] ss:$24 sps:$4 sm:$0xff]  }
  0xc5   : > { %1311 = vmatpush1.bf16.msra.mxu1 %v4461_v18  ;;  %1504 = vmatpush1.bf16.msra.mxu0 %v4464_v19  ;;  %v4533_v18 = vld [vmem:[#allocation5 + $0x2d8] ss:$24 sps:$4 sm:$0xff]  }
  0xc6   : > { %1312 = vmatprep.subr.bf16.mxu1 %v4475_v20  ;;  %1505 = vmatprep.subr.bf16.mxu0 %v4478_v21  ;;  %v4536_v19 = vld [vmem:[#allocation5 + $0x2e0] ss:$24 sps:$4 sm:$0xff]  }
  0xc8   : > { %1176 = vmatmul.mubr.bf16.gmra.mrb[16].mxu0 %v4992_v22  ;;  %1256 = vmatmul.mubr.bf16.gmra.mrb[16].mxu1 %v4995_v23 }
  0xc9   : > { %1313 = vmatpush1.bf16.msra.mxu1 %v4473_v24  ;;  %1506 = vmatpush1.bf16.msra.mxu0 %v4476_v25 }
  0xca   : > { %1314 = vmatprep.subr.bf16.mxu1 %v4481_v26  ;;  %1507 = vmatprep.subr.bf16.mxu0 %v4484_v27 }
  0xcb   : > { %1185 = vmatprep.mubr.bf16.mxu0 %v4998_v28  ;;  %1265 = vmatprep.mubr.bf16.mxu1 %v5001_v29 }
  0xcd   : > { %1315 = vmatpush1.bf16.msra.mxu1 %v4479_v30  ;;  %1508 = vmatpush1.bf16.msra.mxu0 %v4482_v31 }
  0xce   : > { %1316 = vmatprep.subr.bf16.mxu1 %v4493_v32  ;;  %1509 = vmatprep.subr.bf16.mxu0 %v4496_v33 }
  0xd0   : > { %1186 = vmatmul.mubr.bf16.gmra.mrb[20].mxu0 %v5008_v34  ;;  %1266 = vmatmul.mubr.bf16.gmra.mrb[20].mxu1 %v5011_v36 }
  0xd1   : > { %1317 = vmatpush1.bf16.msra.mxu1 %v4491_v38  ;;  %1510 = vmatpush1.bf16.msra.mxu0 %v4494_v39 }
  0xd2   : > { %1318 = vmatprep.subr.bf16.mxu1 %v4499_v40  ;;  %1511 = vmatprep.subr.bf16.mxu0 %v4502_v41 }
  0xd3   : > { %1195 = vmatprep.mubr.bf16.mxu0 %v5014_v44  ;;  %1275 = vmatprep.mubr.bf16.mxu1 %v5017_v45 }
  0xd5   : > { %1319 = vmatpush1.bf16.msra.mxu1 %v4497_v46  ;;  %1512 = vmatpush1.bf16.msra.mxu0 %v4500_v48 }
  0xd6   : > { %1320 = vmatprep.subr.bf16.mxu1 %v4511_v50  ;;  %1513 = vmatprep.subr.bf16.mxu0 %v4514_v51 }
  0xd8   : > { %1196 = vmatmul.mubr.bf16.gmra.mrb[24].mxu0 %v5024_v52  ;;  %1276 = vmatmul.mubr.bf16.gmra.mrb[24].mxu1 %v5027_v53 }
  0xd9   : > { %1321 = vmatpush1.bf16.msra.mxu1 %v4509_v56  ;;  %1514 = vmatpush1.bf16.msra.mxu0 %v4512_v57 }
  0xda   : > { %1322 = vmatprep.subr.bf16.mxu1 %v4517_v58  ;;  %1515 = vmatprep.subr.bf16.mxu0 %v4520_v60 }
  0xdb   : > { %1205 = vmatprep.mubr.bf16.mxu0 %v4521_v62  ;;  %1285 = vmatprep.mubr.bf16.mxu1 %v5031_v63 }
  0xdd   : > { %1323 = vmatpush1.bf16.msra.mxu1 %v4515_v0  ;;  %1516 = vmatpush1.bf16.msra.mxu0 %v4518_v1 }
  0xde   : > { %1324 = vmatprep.subr.bf16.mxu1 %v4529_v4  ;;  %1517 = vmatprep.subr.bf16.mxu0 %v4532_v5 }
  0xe0   : > { %1206 = vmatmul.mubr.bf16.gmra.mrb[28].mxu0 %v4525_v6  ;;  %1286 = vmatmul.mubr.bf16.gmra.mrb[28].mxu1 %v5038_v7 }
  0xe1   : > { %1325 = vmatpush1.bf16.msra.mxu1 %v4527_v10  ;;  %1518 = vmatpush1.bf16.msra.mxu0 %v4530_v11 }
  0xe2   : > { %1326 = vmatprep.subr.bf16.mxu1 %v4535_v12  ;;  %1519 = vmatprep.subr.bf16.mxu0 %v4538_v14 }
  0xe3   : > { %1328 = vmatprep.mubr.bf16.mxu1 %v4920_v13  ;;  %1521 = vmatprep.mubr.bf16.mxu0 %v4920_v13  ;;  %v433_v13 = vlaneseq }
  0xe5   : > { %1327 = vmatpush1.bf16.msra.mxu1 %v4533_v18  ;;  %1520 = vmatpush1.bf16.msra.mxu0 %v4536_v19 }
  0xe8   : > { %1329 = vmatmul.mubr.bf16.vlgmr.msra.gmra.mrb[32].mxu1 %v4928_v35  ;;  %1522 = vmatmul.mubr.bf16.vlgmr.msra.gmra.mrb[32].mxu0 %v4928_v35 }
  0xe9   : > { %1338 = vmatprep.mubr.bf16.mxu1 %v4934_v42  ;;  %1531 = vmatprep.mubr.bf16.mxu0 %v4934_v42 }
  0xf0   : > { %1339 = vmatmul.mubr.bf16.gmra.mrb[36].mxu1 %v4942_v47  ;;  %1532 = vmatmul.mubr.bf16.gmra.mrb[36].mxu0 %v4942_v47 }
  0xf1   : > { %1348 = vmatprep.mubr.bf16.mxu1 %v4950_v54  ;;  %1541 = vmatprep.mubr.bf16.mxu0 %v4950_v54 }
  0xf8   : > { %1349 = vmatmul.mubr.bf16.gmra.mrb[40].mxu1 %v4958_v59  ;;  %1542 = vmatmul.mubr.bf16.gmra.mrb[40].mxu0 %v4958_v59 }
  0xf9   : > { %1358 = vmatprep.mubr.bf16.mxu1 %v4966_v2  ;;  %1551 = vmatprep.mubr.bf16.mxu0 %v4966_v2 }
 0x100   : > { %1359 = vmatmul.mubr.bf16.gmra.mrb[44].mxu1 %v4976_v8  ;;  %1552 = vmatmul.mubr.bf16.gmra.mrb[44].mxu0 %v4976_v8 }
 0x101   : > { %1368 = vmatprep.mubr.bf16.mxu1 %v4982_v16  ;;  %1561 = vmatprep.mubr.bf16.mxu0 %v4982_v16 }
 0x108   : > { %1369 = vmatmul.mubr.bf16.gmra.mrb[48].mxu1 %v4992_v22  ;;  %1562 = vmatmul.mubr.bf16.gmra.mrb[48].mxu0 %v4992_v22 }
 0x109   : > { %1378 = vmatprep.mubr.bf16.mxu1 %v4998_v28  ;;  %1571 = vmatprep.mubr.bf16.mxu0 %v4998_v28 }
 0x110   : > { %1379 = vmatmul.mubr.bf16.gmra.mrb[52].mxu1 %v5008_v34  ;;  %1572 = vmatmul.mubr.bf16.gmra.mrb[52].mxu0 %v5008_v34 }
 0x111   : > { %1388 = vmatprep.mubr.bf16.mxu1 %v5014_v44  ;;  %1581 = vmatprep.mubr.bf16.mxu0 %v5014_v44 }
 0x118   : > { %1389 = vmatmul.mubr.bf16.gmra.mrb[56].mxu1 %v5024_v52  ;;  %1582 = vmatmul.mubr.bf16.gmra.mrb[56].mxu0 %v5024_v52 }
 0x119   : > { %1398 = vmatprep.mubr.bf16.mxu1 %v4521_v62  ;;  %1591 = vmatprep.mubr.bf16.mxu0 %v4521_v62 }
 0x120   : > { %1399 = vmatmul.mubr.bf16.gmra.mrb[60].mxu1 %v4525_v6  ;;  %1592 = vmatmul.mubr.bf16.gmra.mrb[60].mxu0 %v4525_v6 }
 0x121   : > { %1408 = vmatprep.mubr.bf16.mxu1 %v4923_v15  ;;  %1601 = vmatprep.mubr.bf16.mxu0 %v4923_v15  ;;  %v5101_v15 = vshrl.u32 %v433_v13, 7 }
 0x123   : > { %v435_v35 = vsub.s32 0, %v5101_v15  ;;  %v439_v42 = vsub.s32 1, %v5101_v15 }
 0x128   : > { %1409 = vmatmul.mubr.bf16.gmra.mrb[64].mxu1 %v4931_v37  ;;  %1602 = vmatmul.mubr.bf16.gmra.mrb[64].mxu0 %v4931_v37  ;;  %v5107_v37 = vld [vmem:[%s5530_s2] sm:$0x3f] }
 0x129   : > { %1418 = vmatprep.mubr.bf16.mxu1 %v4937_v43  ;;  %1611 = vmatprep.mubr.bf16.mxu0 %v4937_v43  ;;  %v5111_v43 = vrot.slane %v5107_v37, %v435_v35  ;;  %v5114_v54 = vrot.slane %v5107_v37, %v439_v42 }
 0x130   : > { %1419 = vmatmul.mubr.bf16.gmra.mrb[68].mxu1 %v4947_v49  ;;  %1612 = vmatmul.mubr.bf16.gmra.mrb[68].mxu0 %v4947_v49 }
 0x131   : > { %1428 = vmatprep.mubr.bf16.mxu1 %v4953_v55  ;;  %1621 = vmatprep.mubr.bf16.mxu0 %v4953_v55 }
 0x138   : > { %1429 = vmatmul.mubr.bf16.gmra.mrb[72].mxu1 %v4963_v61  ;;  %1622 = vmatmul.mubr.bf16.gmra.mrb[72].mxu0 %v4963_v61 }
 0x139   : > { %1438 = vmatprep.mubr.bf16.mxu1 %v4969_v3  ;;  %1631 = vmatprep.mubr.bf16.mxu0 %v4969_v3 }
 0x140   : > { %1439 = vmatmul.mubr.bf16.gmra.mrb[76].mxu1 %v4979_v9  ;;  %1632 = vmatmul.mubr.bf16.gmra.mrb[76].mxu0 %v4979_v9 }
 0x141   : > { %1448 = vmatprep.mubr.bf16.mxu1 %v4985_v17  ;;  %1641 = vmatprep.mubr.bf16.mxu0 %v4985_v17 }
 0x148   : > { %1449 = vmatmul.mubr.bf16.gmra.mrb[80].mxu1 %v4995_v23  ;;  %1642 = vmatmul.mubr.bf16.gmra.mrb[80].mxu0 %v4995_v23 }
 0x149   : > { %1458 = vmatprep.mubr.bf16.mxu1 %v5001_v29  ;;  %1651 = vmatprep.mubr.bf16.mxu0 %v5001_v29 }
 0x150   : > { %1459 = vmatmul.mubr.bf16.gmra.mrb[84].mxu1 %v5011_v36  ;;  %1652 = vmatmul.mubr.bf16.gmra.mrb[84].mxu0 %v5011_v36 }
 0x151   : > { %1468 = vmatprep.mubr.bf16.mxu1 %v5017_v45  ;;  %1661 = vmatprep.mubr.bf16.mxu0 %v5017_v45 }
 0x158   : > { %1469 = vmatmul.mubr.bf16.gmra.mrb[88].mxu1 %v5027_v53  ;;  %1662 = vmatmul.mubr.bf16.gmra.mrb[88].mxu0 %v5027_v53 }
 0x159   : > { %1478 = vmatprep.mubr.bf16.mxu1 %v5031_v63  ;;  %1671 = vmatprep.mubr.bf16.mxu0 %v5031_v63 }
 0x160   : > { %1479 = vmatmul.mubr.bf16.gmra.mrb[92].mxu1 %v5038_v7  ;;  %1672 = vmatmul.mubr.bf16.gmra.mrb[92].mxu0 %v5038_v7 }
 0x17b   : > { %v1137_v47 = vpop.f32.mrb[0].mxu0  ;;  %v1217_v49 = vpop.f32.mrb[0].mxu1 }
 0x17c   : > { %v1139_v55 = vpop.f32.mrb[1].mxu0  ;;  %v1219_v59 = vpop.f32.mrb[1].mxu1  ;;  %v1138_v3 = vadd.f32 %v1137_v47, %v5111_v43  ;;  %v1218_v8 = vadd.f32 %v1217_v49, %v5111_v43 }
 0x17d   : > { %v1141_v61 = vpop.f32.mrb[2].mxu0  ;;  %v1221_v2 = vpop.f32.mrb[2].mxu1  ;;  %v1140_v21 = vadd.f32 %v1139_v55, %v5114_v54  ;;  %v1220_v22 = vadd.f32 %v1219_v59, %v5114_v54 }
 0x17e   : > { %v1142_v9 = vadd.f32 %v1141_v61, %v5111_v43  ;;  %v1222_v16 = vadd.f32 %v1221_v2, %v5111_v43  ;;  %v1143_v17 = vpop.f32.mrb[3].mxu0  ;;  %v1223_v20 = vpop.f32.mrb[3].mxu1 }
 0x17f   : > { %v1144_v23 = vadd.f32 %v1143_v17, %v5114_v54  ;;  %v1224_v24 = vadd.f32 %v1223_v20, %v5114_v54 }
 0x180   : > { %v3603_v25 = vpack.c.bf16 %v1142_v9, %v1138_v3  ;;  %v3643_v26 = vpack.c.bf16 %v1222_v16, %v1218_v8 }
 0x181   : > { %v3843_v27 = vpack.c.bf16 %v1144_v23, %v1140_v21  ;;  %v3883_v28 = vpack.c.bf16 %v1224_v24, %v1220_v22 }
 0x182   : > { %3604 = vst [vmem:[%s5125_s28] sm:$0xff] %v3603_v25   ;;  %4087 = vst [vmem:[%s5125_s28 + $0x40] sm:$0xff] %v3643_v26  }
 0x183   : > { %4125 = vst [vmem:[%s5125_s28 + $0x80] sm:$0xff] %v3843_v27   ;;  %4133 = vst [vmem:[%s5125_s28 + $0xc0] sm:$0xff] %v3883_v28   ;;  %v1147_v29 = vpop.f32.mrb[4].mxu0  ;;  %v1227_v30 = vpop.f32.mrb[4].mxu1 }
 0x184   : > { %v1149_v31 = vpop.f32.mrb[5].mxu0  ;;  %v1229_v32 = vpop.f32.mrb[5].mxu1  ;;  %v1148_v36 = vadd.f32 %v1147_v29, %v5111_v43  ;;  %v1228_v38 = vadd.f32 %v1227_v30, %v5111_v43 }
 0x185   : > { %v1151_v33 = vpop.f32.mrb[6].mxu0  ;;  %v1231_v34 = vpop.f32.mrb[6].mxu1  ;;  %v1150_v45 = vadd.f32 %v1149_v31, %v5114_v54  ;;  %v1230_v46 = vadd.f32 %v1229_v32, %v5114_v54 }
 0x186   : > { %v1152_v39 = vadd.f32 %v1151_v33, %v5111_v43  ;;  %v1232_v40 = vadd.f32 %v1231_v34, %v5111_v43  ;;  %v1153_v41 = vpop.f32.mrb[7].mxu0  ;;  %v1233_v44 = vpop.f32.mrb[7].mxu1 }
 0x187   : > { %v1154_v48 = vadd.f32 %v1153_v41, %v5114_v54  ;;  %v1234_v50 = vadd.f32 %v1233_v44, %v5114_v54 }
 0x188   : > { %v3608_v51 = vpack.c.bf16 %v1152_v39, %v1148_v36  ;;  %v3648_v52 = vpack.c.bf16 %v1232_v40, %v1228_v38 }
 0x189   : > { %v3848_v53 = vpack.c.bf16 %v1154_v48, %v1150_v45  ;;  %v3888_v56 = vpack.c.bf16 %v1234_v50, %v1230_v46 }
 0x18a   : > { %4080 = vst [vmem:[%s5125_s28 + $0x8] sm:$0xff] %v3608_v51   ;;  %4088 = vst [vmem:[%s5125_s28 + $0x48] sm:$0xff] %v3648_v52  }
 0x18b   : > { %4126 = vst [vmem:[%s5125_s28 + $0x88] sm:$0xff] %v3848_v53   ;;  %4134 = vst [vmem:[%s5125_s28 + $0xc8] sm:$0xff] %v3888_v56   ;;  %v1157_v57 = vpop.f32.mrb[8].mxu0  ;;  %v1237_v58 = vpop.f32.mrb[8].mxu1 }
 0x18c   : > { %v1159_v60 = vpop.f32.mrb[9].mxu0  ;;  %v1239_v62 = vpop.f32.mrb[9].mxu1  ;;  %v1158_v1 = vadd.f32 %v1157_v57, %v5111_v43  ;;  %v1238_v4 = vadd.f32 %v1237_v58, %v5111_v43 }
 0x18d   : > { %v1161_v63 = vpop.f32.mrb[10].mxu0  ;;  %v1241_v0 = vpop.f32.mrb[10].mxu1  ;;  %v1160_v11 = vadd.f32 %v1159_v60, %v5114_v54  ;;  %v1240_v12 = vadd.f32 %v1239_v62, %v5114_v54 }
 0x18e   : > { %v1162_v5 = vadd.f32 %v1161_v63, %v5111_v43  ;;  %v1242_v6 = vadd.f32 %v1241_v0, %v5111_v43  ;;  %v1163_v7 = vpop.f32.mrb[11].mxu0  ;;  %v1243_v10 = vpop.f32.mrb[11].mxu1 }
 0x18f   : > { %v1164_v14 = vadd.f32 %v1163_v7, %v5114_v54  ;;  %v1244_v18 = vadd.f32 %v1243_v10, %v5114_v54 }
 0x190   : > { %v3613_v19 = vpack.c.bf16 %v1162_v5, %v1158_v1  ;;  %v3653_v13 = vpack.c.bf16 %v1242_v6, %v1238_v4 }
 0x191   : > { %v3853_v35 = vpack.c.bf16 %v1164_v14, %v1160_v11  ;;  %v3893_v42 = vpack.c.bf16 %v1244_v18, %v1240_v12 }
 0x192   : > { %4081 = vst [vmem:[%s5125_s28 + $0x10] sm:$0xff] %v3613_v19   ;;  %4089 = vst [vmem:[%s5125_s28 + $0x50] sm:$0xff] %v3653_v13  }
 0x193   : > { %4127 = vst [vmem:[%s5125_s28 + $0x90] sm:$0xff] %v3853_v35   ;;  %4135 = vst [vmem:[%s5125_s28 + $0xd0] sm:$0xff] %v3893_v42   ;;  %v1167_v47 = vpop.f32.mrb[12].mxu0  ;;  %v1247_v49 = vpop.f32.mrb[12].mxu1 }
 0x194   : > { %v1169_v55 = vpop.f32.mrb[13].mxu0  ;;  %v1249_v59 = vpop.f32.mrb[13].mxu1  ;;  %v1168_v3 = vadd.f32 %v1167_v47, %v5111_v43  ;;  %v1248_v8 = vadd.f32 %v1247_v49, %v5111_v43 }
 0x195   : > { %v1171_v61 = vpop.f32.mrb[14].mxu0  ;;  %v1251_v2 = vpop.f32.mrb[14].mxu1  ;;  %v1170_v21 = vadd.f32 %v1169_v55, %v5114_v54  ;;  %v1250_v22 = vadd.f32 %v1249_v59, %v5114_v54 }
 0x196   : > { %v1172_v9 = vadd.f32 %v1171_v61, %v5111_v43  ;;  %v1252_v16 = vadd.f32 %v1251_v2, %v5111_v43  ;;  %v1173_v17 = vpop.f32.mrb[15].mxu0  ;;  %v1253_v20 = vpop.f32.mrb[15].mxu1 }
 0x197   : > { %v1174_v23 = vadd.f32 %v1173_v17, %v5114_v54  ;;  %v1254_v24 = vadd.f32 %v1253_v20, %v5114_v54 }
 0x198   : > { %v3618_v25 = vpack.c.bf16 %v1172_v9, %v1168_v3  ;;  %v3658_v26 = vpack.c.bf16 %v1252_v16, %v1248_v8 }
 0x199   : > { %v3858_v27 = vpack.c.bf16 %v1174_v23, %v1170_v21  ;;  %v3898_v28 = vpack.c.bf16 %v1254_v24, %v1250_v22 }
 0x19a   : > { %4082 = vst [vmem:[%s5125_s28 + $0x18] sm:$0xff] %v3618_v25   ;;  %4090 = vst [vmem:[%s5125_s28 + $0x58] sm:$0xff] %v3658_v26  }
 0x19b   : > { %4128 = vst [vmem:[%s5125_s28 + $0x98] sm:$0xff] %v3858_v27   ;;  %4136 = vst [vmem:[%s5125_s28 + $0xd8] sm:$0xff] %v3898_v28   ;;  %v1177_v29 = vpop.f32.mrb[16].mxu0  ;;  %v1257_v30 = vpop.f32.mrb[16].mxu1 }
 0x19c   : > { %v1179_v31 = vpop.f32.mrb[17].mxu0  ;;  %v1259_v32 = vpop.f32.mrb[17].mxu1  ;;  %v1178_v36 = vadd.f32 %v1177_v29, %v5111_v43  ;;  %v1258_v38 = vadd.f32 %v1257_v30, %v5111_v43 }
 0x19d   : > { %v1181_v33 = vpop.f32.mrb[18].mxu0  ;;  %v1261_v34 = vpop.f32.mrb[18].mxu1  ;;  %v1180_v45 = vadd.f32 %v1179_v31, %v5114_v54  ;;  %v1260_v46 = vadd.f32 %v1259_v32, %v5114_v54 }
 0x19e   : > { %v1182_v39 = vadd.f32 %v1181_v33, %v5111_v43  ;;  %v1262_v40 = vadd.f32 %v1261_v34, %v5111_v43  ;;  %v1183_v41 = vpop.f32.mrb[19].mxu0  ;;  %v1263_v44 = vpop.f32.mrb[19].mxu1 }
 0x19f   : > { %v1184_v48 = vadd.f32 %v1183_v41, %v5114_v54  ;;  %v1264_v50 = vadd.f32 %v1263_v44, %v5114_v54 }
 0x1a0   : > { %v3623_v51 = vpack.c.bf16 %v1182_v39, %v1178_v36  ;;  %v3663_v52 = vpack.c.bf16 %v1262_v40, %v1258_v38  ;;  %v443_v36 = vsub.s32 2, %v5101_v15  ;;  %v451_v38 = vsub.s32 4, %v5101_v15 }
 0x1a1   : > { %v3863_v53 = vpack.c.bf16 %v1184_v48, %v1180_v45  ;;  %v3903_v56 = vpack.c.bf16 %v1264_v50, %v1260_v46  ;;  %v447_v39 = vsub.s32 3, %v5101_v15  ;;  %v455_v40 = vsub.s32 5, %v5101_v15 }
 0x1a2   : > { %4083 = vst [vmem:[%s5125_s28 + $0x20] sm:$0xff] %v3623_v51   ;;  %4091 = vst [vmem:[%s5125_s28 + $0x60] sm:$0xff] %v3663_v52  }
 0x1a3   : > { %4129 = vst [vmem:[%s5125_s28 + $0xa0] sm:$0xff] %v3863_v53   ;;  %4137 = vst [vmem:[%s5125_s28 + $0xe0] sm:$0xff] %v3903_v56   ;;  %v1187_v57 = vpop.f32.mrb[20].mxu0  ;;  %v1267_v58 = vpop.f32.mrb[20].mxu1 }
 0x1a4   : > { %v1189_v60 = vpop.f32.mrb[21].mxu0  ;;  %v1269_v62 = vpop.f32.mrb[21].mxu1  ;;  %v1188_v1 = vadd.f32 %v1187_v57, %v5111_v43  ;;  %v1268_v4 = vadd.f32 %v1267_v58, %v5111_v43 }
 0x1a5   : > { %v1191_v63 = vpop.f32.mrb[22].mxu0  ;;  %v1271_v0 = vpop.f32.mrb[22].mxu1  ;;  %v1190_v11 = vadd.f32 %v1189_v60, %v5114_v54  ;;  %v1270_v12 = vadd.f32 %v1269_v62, %v5114_v54  ;;  %v5221_v62 = vrot.slane %v5107_v37, %v451_v38 }
 0x1a6   : > { %v1192_v5 = vadd.f32 %v1191_v63, %v5111_v43  ;;  %v1272_v6 = vadd.f32 %v1271_v0, %v5111_v43  ;;  %v1193_v7 = vpop.f32.mrb[23].mxu0  ;;  %v1273_v10 = vpop.f32.mrb[23].mxu1 }
 0x1a7   : > { %v1194_v14 = vadd.f32 %v1193_v7, %v5114_v54  ;;  %v1274_v18 = vadd.f32 %v1273_v10, %v5114_v54 }
 0x1a8   : > { %v3628_v19 = vpack.c.bf16 %v1192_v5, %v1188_v1  ;;  %v3668_v13 = vpack.c.bf16 %v1272_v6, %v1268_v4  ;;  %v5227_v1 = vrot.slane %v5107_v37, %v447_v39 }
 0x1a9   : > { %v3868_v35 = vpack.c.bf16 %v1194_v14, %v1190_v11  ;;  %v3908_v42 = vpack.c.bf16 %v1274_v18, %v1270_v12 }
 0x1aa   : > { %4084 = vst [vmem:[%s5125_s28 + $0x28] sm:$0xff] %v3628_v19   ;;  %4092 = vst [vmem:[%s5125_s28 + $0x68] sm:$0xff] %v3668_v13  }
 0x1ab   : > { %4130 = vst [vmem:[%s5125_s28 + $0xa8] sm:$0xff] %v3868_v35   ;;  %4138 = vst [vmem:[%s5125_s28 + $0xe8] sm:$0xff] %v3908_v42   ;;  %v1197_v47 = vpop.f32.mrb[24].mxu0  ;;  %v1277_v49 = vpop.f32.mrb[24].mxu1 }
 0x1ac   : > { %v1199_v55 = vpop.f32.mrb[25].mxu0  ;;  %v1279_v59 = vpop.f32.mrb[25].mxu1  ;;  %v1198_v3 = vadd.f32 %v1197_v47, %v5111_v43  ;;  %v1278_v8 = vadd.f32 %v1277_v49, %v5111_v43 }
 0x1ad   : > { %v1201_v61 = vpop.f32.mrb[26].mxu0  ;;  %v1281_v2 = vpop.f32.mrb[26].mxu1  ;;  %v1200_v21 = vadd.f32 %v1199_v55, %v5114_v54  ;;  %v1280_v22 = vadd.f32 %v1279_v59, %v5114_v54 }
 0x1ae   : > { %v1202_v9 = vadd.f32 %v1201_v61, %v5111_v43  ;;  %v1282_v16 = vadd.f32 %v1281_v2, %v5111_v43  ;;  %v1203_v17 = vpop.f32.mrb[27].mxu0  ;;  %v1283_v20 = vpop.f32.mrb[27].mxu1 }
 0x1af   : > { %v1204_v23 = vadd.f32 %v1203_v17, %v5114_v54  ;;  %v1284_v24 = vadd.f32 %v1283_v20, %v5114_v54 }
 0x1b0   : > { %v3633_v25 = vpack.c.bf16 %v1202_v9, %v1198_v3  ;;  %v3673_v26 = vpack.c.bf16 %v1282_v16, %v1278_v8 }
 0x1b1   : > { %v3873_v27 = vpack.c.bf16 %v1204_v23, %v1200_v21  ;;  %v3913_v28 = vpack.c.bf16 %v1284_v24, %v1280_v22 }
 0x1b2   : > { %4085 = vst [vmem:[%s5125_s28 + $0x30] sm:$0xff] %v3633_v25   ;;  %4093 = vst [vmem:[%s5125_s28 + $0x70] sm:$0xff] %v3673_v26  }
 0x1b3   : > { %4131 = vst [vmem:[%s5125_s28 + $0xb0] sm:$0xff] %v3873_v27   ;;  %4139 = vst [vmem:[%s5125_s28 + $0xf0] sm:$0xff] %v3913_v28   ;;  %v1207_v29 = vpop.f32.mrb[28].mxu0  ;;  %v1287_v30 = vpop.f32.mrb[28].mxu1 }
 0x1b4   : > { %v1209_v31 = vpop.f32.mrb[29].mxu0  ;;  %v1289_v32 = vpop.f32.mrb[29].mxu1  ;;  %v1208_v41 = vadd.f32 %v1207_v29, %v5111_v43  ;;  %v1288_v44 = vadd.f32 %v1287_v30, %v5111_v43 }
 0x1b5   : > { %v1211_v33 = vpop.f32.mrb[30].mxu0  ;;  %v1291_v34 = vpop.f32.mrb[30].mxu1  ;;  %v1210_v51 = vadd.f32 %v1209_v31, %v5114_v54  ;;  %v1290_v52 = vadd.f32 %v1289_v32, %v5114_v54 }
 0x1b6   : > { %v1212_v45 = vadd.f32 %v1211_v33, %v5111_v43  ;;  %v1292_v46 = vadd.f32 %v1291_v34, %v5111_v43  ;;  %v1213_v48 = vpop.f32.mrb[31].mxu0  ;;  %v1293_v50 = vpop.f32.mrb[31].mxu1  ;;  %v5218_v43 = vrot.slane %v5107_v37, %v443_v36 }
 0x1b7   : > { %v1214_v15 = vadd.f32 %v1213_v48, %v5114_v54  ;;  %v1294_v53 = vadd.f32 %v1293_v50, %v5114_v54  ;;  %v5230_v54 = vrot.slane %v5107_v37, %v455_v40 }
 0x1b8   : > { %v3638_v56 = vpack.c.bf16 %v1212_v45, %v1208_v41  ;;  %v3678_v57 = vpack.c.bf16 %v1292_v46, %v1288_v44 }
 0x1b9   : > { %v3878_v58 = vpack.c.bf16 %v1214_v15, %v1210_v51  ;;  %v3918_v60 = vpack.c.bf16 %v1294_v53, %v1290_v52 }
 0x1ba   : > { %4086 = vst [vmem:[%s5125_s28 + $0x38] sm:$0xff] %v3638_v56   ;;  %4094 = vst [vmem:[%s5125_s28 + $0x78] sm:$0xff] %v3678_v57  }
 0x1bb   : > { %4132 = vst [vmem:[%s5125_s28 + $0xb8] sm:$0xff] %v3878_v58   ;;  %4140 = vst [vmem:[%s5125_s28 + $0xf8] sm:$0xff] %v3918_v60   ;;  %v1330_v63 = vpop.f32.mrb[32].mxu1  ;;  %v1523_v0 = vpop.f32.mrb[32].mxu0 }
 0x1bc   : > { %v1332_v4 = vpop.f32.mrb[33].mxu1  ;;  %v1525_v5 = vpop.f32.mrb[33].mxu0  ;;  %v1331_v10 = vadd.f32 %v1330_v63, %v5218_v43  ;;  %v1524_v11 = vadd.f32 %v1523_v0, %v5221_v62 }
 0x1bd   : > { %v1334_v6 = vpop.f32.mrb[34].mxu1  ;;  %v1527_v7 = vpop.f32.mrb[34].mxu0  ;;  %v1333_v13 = vadd.f32 %v1332_v4, %v5227_v1  ;;  %v1526_v37 = vadd.f32 %v1525_v5, %v5230_v54 }
 0x1be   : > { %v1335_v12 = vadd.f32 %v1334_v6, %v5218_v43  ;;  %v1528_v14 = vadd.f32 %v1527_v7, %v5221_v62  ;;  %v1336_v18 = vpop.f32.mrb[35].mxu1  ;;  %v1529_v19 = vpop.f32.mrb[35].mxu0 }
 0x1bf   : > { %v1337_v35 = vadd.f32 %v1336_v18, %v5227_v1  ;;  %v1530_v42 = vadd.f32 %v1529_v19, %v5230_v54 }
 0x1c0   : > { %v3683_v47 = vpack.c.bf16 %v1335_v12, %v1331_v10  ;;  %v3763_v49 = vpack.c.bf16 %v1528_v14, %v1524_v11 }
 0x1c1   : > { %v3923_v55 = vpack.c.bf16 %v1337_v35, %v1333_v13  ;;  %v4003_v59 = vpack.c.bf16 %v1530_v42, %v1526_v37 }
 0x1c2   : > { %3684 = vst [vmem:[%s5241_s14] sm:$0xff] %v3683_v47   ;;  %3764 = vst [vmem:[%s5245_s27] sm:$0xff] %v3763_v49  }
 0x1c3   : > { %4141 = vst [vmem:[%s5241_s14 + $0x80] sm:$0xff] %v3923_v55   ;;  %4157 = vst [vmem:[%s5245_s27 + $0x80] sm:$0xff] %v4003_v59   ;;  %v1340_v61 = vpop.f32.mrb[36].mxu1  ;;  %v1533_v2 = vpop.f32.mrb[36].mxu0 }
 0x1c4   : > { %v1342_v3 = vpop.f32.mrb[37].mxu1  ;;  %v1535_v8 = vpop.f32.mrb[37].mxu0  ;;  %v1341_v17 = vadd.f32 %v1340_v61, %v5218_v43  ;;  %v1534_v20 = vadd.f32 %v1533_v2, %v5221_v62 }
 0x1c5   : > { %v1344_v9 = vpop.f32.mrb[38].mxu1  ;;  %v1537_v16 = vpop.f32.mrb[38].mxu0  ;;  %v1343_v25 = vadd.f32 %v1342_v3, %v5227_v1  ;;  %v1536_v26 = vadd.f32 %v1535_v8, %v5230_v54 }
 0x1c6   : > { %v1345_v21 = vadd.f32 %v1344_v9, %v5218_v43  ;;  %v1538_v22 = vadd.f32 %v1537_v16, %v5221_v62  ;;  %v1346_v23 = vpop.f32.mrb[39].mxu1  ;;  %v1539_v24 = vpop.f32.mrb[39].mxu0 }
 0x1c7   : > { %v1347_v27 = vadd.f32 %v1346_v23, %v5227_v1  ;;  %v1540_v28 = vadd.f32 %v1539_v24, %v5230_v54 }
 0x1c8   : > { %v3688_v29 = vpack.c.bf16 %v1345_v21, %v1341_v17  ;;  %v3768_v30 = vpack.c.bf16 %v1538_v22, %v1534_v20 }
 0x1c9   : > { %v3928_v31 = vpack.c.bf16 %v1347_v27, %v1343_v25  ;;  %v4008_v32 = vpack.c.bf16 %v1540_v28, %v1536_v26 }
 0x1ca   : > { %4095 = vst [vmem:[%s5241_s14 + $0x8] sm:$0xff] %v3688_v29   ;;  %4110 = vst [vmem:[%s5245_s27 + $0x8] sm:$0xff] %v3768_v30  }
 0x1cb   : > { %4142 = vst [vmem:[%s5241_s14 + $0x88] sm:$0xff] %v3928_v31   ;;  %4158 = vst [vmem:[%s5245_s27 + $0x88] sm:$0xff] %v4008_v32   ;;  %v1350_v33 = vpop.f32.mrb[40].mxu1  ;;  %v1543_v34 = vpop.f32.mrb[40].mxu0 }
 0x1cc   : > { %v1352_v36 = vpop.f32.mrb[41].mxu1  ;;  %v1545_v38 = vpop.f32.mrb[41].mxu0  ;;  %v1351_v41 = vadd.f32 %v1350_v33, %v5218_v43  ;;  %v1544_v44 = vadd.f32 %v1543_v34, %v5221_v62 }
 0x1cd   : > { %v1354_v39 = vpop.f32.mrb[42].mxu1  ;;  %v1547_v40 = vpop.f32.mrb[42].mxu0  ;;  %v1353_v51 = vadd.f32 %v1352_v36, %v5227_v1  ;;  %v1546_v52 = vadd.f32 %v1545_v38, %v5230_v54 }
 0x1ce   : > { %v1355_v45 = vadd.f32 %v1354_v39, %v5218_v43  ;;  %v1548_v46 = vadd.f32 %v1547_v40, %v5221_v62  ;;  %v1356_v48 = vpop.f32.mrb[43].mxu1  ;;  %v1549_v50 = vpop.f32.mrb[43].mxu0 }
 0x1cf   : > { %v1357_v15 = vadd.f32 %v1356_v48, %v5227_v1  ;;  %v1550_v53 = vadd.f32 %v1549_v50, %v5230_v54 }
 0x1d0   : > { %v3693_v56 = vpack.c.bf16 %v1355_v45, %v1351_v41  ;;  %v3773_v57 = vpack.c.bf16 %v1548_v46, %v1544_v44 }
 0x1d1   : > { %v3933_v58 = vpack.c.bf16 %v1357_v15, %v1353_v51  ;;  %v4013_v60 = vpack.c.bf16 %v1550_v53, %v1546_v52 }
 0x1d2   : > { %4096 = vst [vmem:[%s5241_s14 + $0x10] sm:$0xff] %v3693_v56   ;;  %4111 = vst [vmem:[%s5245_s27 + $0x10] sm:$0xff] %v3773_v57  }
 0x1d3   : > { %4143 = vst [vmem:[%s5241_s14 + $0x90] sm:$0xff] %v3933_v58   ;;  %4159 = vst [vmem:[%s5245_s27 + $0x90] sm:$0xff] %v4013_v60   ;;  %v1360_v63 = vpop.f32.mrb[44].mxu1  ;;  %v1553_v0 = vpop.f32.mrb[44].mxu0 }
 0x1d4   : > { %v1362_v4 = vpop.f32.mrb[45].mxu1  ;;  %v1555_v5 = vpop.f32.mrb[45].mxu0  ;;  %v1361_v10 = vadd.f32 %v1360_v63, %v5218_v43  ;;  %v1554_v11 = vadd.f32 %v1553_v0, %v5221_v62 }
 0x1d5   : > { %v1364_v6 = vpop.f32.mrb[46].mxu1  ;;  %v1557_v7 = vpop.f32.mrb[46].mxu0  ;;  %v1363_v13 = vadd.f32 %v1362_v4, %v5227_v1  ;;  %v1556_v37 = vadd.f32 %v1555_v5, %v5230_v54 }
 0x1d6   : > { %v1365_v12 = vadd.f32 %v1364_v6, %v5218_v43  ;;  %v1558_v14 = vadd.f32 %v1557_v7, %v5221_v62  ;;  %v1366_v18 = vpop.f32.mrb[47].mxu1  ;;  %v1559_v19 = vpop.f32.mrb[47].mxu0 }
 0x1d7   : > { %v1367_v35 = vadd.f32 %v1366_v18, %v5227_v1  ;;  %v1560_v42 = vadd.f32 %v1559_v19, %v5230_v54 }
 0x1d8   : > { %v3698_v47 = vpack.c.bf16 %v1365_v12, %v1361_v10  ;;  %v3778_v49 = vpack.c.bf16 %v1558_v14, %v1554_v11 }
 0x1d9   : > { %v3938_v55 = vpack.c.bf16 %v1367_v35, %v1363_v13  ;;  %v4018_v59 = vpack.c.bf16 %v1560_v42, %v1556_v37 }
 0x1da   : > { %4097 = vst [vmem:[%s5241_s14 + $0x18] sm:$0xff] %v3698_v47   ;;  %4112 = vst [vmem:[%s5245_s27 + $0x18] sm:$0xff] %v3778_v49  }
 0x1db   : > { %4144 = vst [vmem:[%s5241_s14 + $0x98] sm:$0xff] %v3938_v55   ;;  %4160 = vst [vmem:[%s5245_s27 + $0x98] sm:$0xff] %v4018_v59   ;;  %v1370_v61 = vpop.f32.mrb[48].mxu1  ;;  %v1563_v2 = vpop.f32.mrb[48].mxu0 }
 0x1dc   : > { %v1372_v3 = vpop.f32.mrb[49].mxu1  ;;  %v1565_v8 = vpop.f32.mrb[49].mxu0  ;;  %v1371_v17 = vadd.f32 %v1370_v61, %v5218_v43  ;;  %v1564_v20 = vadd.f32 %v1563_v2, %v5221_v62 }
 0x1dd   : > { %v1374_v9 = vpop.f32.mrb[50].mxu1  ;;  %v1567_v16 = vpop.f32.mrb[50].mxu0  ;;  %v1373_v25 = vadd.f32 %v1372_v3, %v5227_v1  ;;  %v1566_v26 = vadd.f32 %v1565_v8, %v5230_v54 }
 0x1de   : > { %v1375_v21 = vadd.f32 %v1374_v9, %v5218_v43  ;;  %v1568_v22 = vadd.f32 %v1567_v16, %v5221_v62  ;;  %v1376_v23 = vpop.f32.mrb[51].mxu1  ;;  %v1569_v24 = vpop.f32.mrb[51].mxu0 }
 0x1df   : > { %v1377_v27 = vadd.f32 %v1376_v23, %v5227_v1  ;;  %v1570_v28 = vadd.f32 %v1569_v24, %v5230_v54 }
 0x1e0   : > { %v3703_v29 = vpack.c.bf16 %v1375_v21, %v1371_v17  ;;  %v3783_v30 = vpack.c.bf16 %v1568_v22, %v1564_v20 }
 0x1e1   : > { %v3943_v31 = vpack.c.bf16 %v1377_v27, %v1373_v25  ;;  %v4023_v32 = vpack.c.bf16 %v1570_v28, %v1566_v26 }
 0x1e2   : > { %4098 = vst [vmem:[%s5241_s14 + $0x20] sm:$0xff] %v3703_v29   ;;  %4113 = vst [vmem:[%s5245_s27 + $0x20] sm:$0xff] %v3783_v30  }
 0x1e3   : > { %4145 = vst [vmem:[%s5241_s14 + $0xa0] sm:$0xff] %v3943_v31   ;;  %4161 = vst [vmem:[%s5245_s27 + $0xa0] sm:$0xff] %v4023_v32   ;;  %v1380_v33 = vpop.f32.mrb[52].mxu1  ;;  %v1573_v34 = vpop.f32.mrb[52].mxu0 }
 0x1e4   : > { %v1382_v36 = vpop.f32.mrb[53].mxu1  ;;  %v1575_v38 = vpop.f32.mrb[53].mxu0  ;;  %v1381_v41 = vadd.f32 %v1380_v33, %v5218_v43  ;;  %v1574_v44 = vadd.f32 %v1573_v34, %v5221_v62 }
 0x1e5   : > { %v1384_v39 = vpop.f32.mrb[54].mxu1  ;;  %v1577_v40 = vpop.f32.mrb[54].mxu0  ;;  %v1383_v51 = vadd.f32 %v1382_v36, %v5227_v1  ;;  %v1576_v52 = vadd.f32 %v1575_v38, %v5230_v54 }
 0x1e6   : > { %v1385_v45 = vadd.f32 %v1384_v39, %v5218_v43  ;;  %v1578_v46 = vadd.f32 %v1577_v40, %v5221_v62  ;;  %v1386_v48 = vpop.f32.mrb[55].mxu1  ;;  %v1579_v50 = vpop.f32.mrb[55].mxu0 }
 0x1e7   : > { %v1387_v15 = vadd.f32 %v1386_v48, %v5227_v1  ;;  %v1580_v53 = vadd.f32 %v1579_v50, %v5230_v54 }
 0x1e8   : > { %v3708_v56 = vpack.c.bf16 %v1385_v45, %v1381_v41  ;;  %v3788_v57 = vpack.c.bf16 %v1578_v46, %v1574_v44 }
 0x1e9   : > { %v3948_v58 = vpack.c.bf16 %v1387_v15, %v1383_v51  ;;  %v4028_v60 = vpack.c.bf16 %v1580_v53, %v1576_v52 }
 0x1ea   : > { %4099 = vst [vmem:[%s5241_s14 + $0x28] sm:$0xff] %v3708_v56   ;;  %4114 = vst [vmem:[%s5245_s27 + $0x28] sm:$0xff] %v3788_v57  }
 0x1eb   : > { %4146 = vst [vmem:[%s5241_s14 + $0xa8] sm:$0xff] %v3948_v58   ;;  %4162 = vst [vmem:[%s5245_s27 + $0xa8] sm:$0xff] %v4028_v60   ;;  %v1390_v63 = vpop.f32.mrb[56].mxu1  ;;  %v1583_v0 = vpop.f32.mrb[56].mxu0 }
 0x1ec   : > { %v1392_v4 = vpop.f32.mrb[57].mxu1  ;;  %v1585_v5 = vpop.f32.mrb[57].mxu0  ;;  %v1391_v10 = vadd.f32 %v1390_v63, %v5218_v43  ;;  %v1584_v11 = vadd.f32 %v1583_v0, %v5221_v62 }
 0x1ed   : > { %v1394_v6 = vpop.f32.mrb[58].mxu1  ;;  %v1587_v7 = vpop.f32.mrb[58].mxu0  ;;  %v1393_v13 = vadd.f32 %v1392_v4, %v5227_v1  ;;  %v1586_v37 = vadd.f32 %v1585_v5, %v5230_v54 }
 0x1ee   : > { %v1395_v12 = vadd.f32 %v1394_v6, %v5218_v43  ;;  %v1588_v14 = vadd.f32 %v1587_v7, %v5221_v62  ;;  %v1396_v18 = vpop.f32.mrb[59].mxu1  ;;  %v1589_v19 = vpop.f32.mrb[59].mxu0 }
 0x1ef   : > { %v1397_v35 = vadd.f32 %v1396_v18, %v5227_v1  ;;  %v1590_v42 = vadd.f32 %v1589_v19, %v5230_v54 }
 0x1f0   : > { %v3713_v47 = vpack.c.bf16 %v1395_v12, %v1391_v10  ;;  %v3793_v49 = vpack.c.bf16 %v1588_v14, %v1584_v11 }
 0x1f1   : > { %v3953_v55 = vpack.c.bf16 %v1397_v35, %v1393_v13  ;;  %v4033_v59 = vpack.c.bf16 %v1590_v42, %v1586_v37 }
 0x1f2   : > { %4100 = vst [vmem:[%s5241_s14 + $0x30] sm:$0xff] %v3713_v47   ;;  %4115 = vst [vmem:[%s5245_s27 + $0x30] sm:$0xff] %v3793_v49  }
 0x1f3   : > { %4147 = vst [vmem:[%s5241_s14 + $0xb0] sm:$0xff] %v3953_v55   ;;  %4163 = vst [vmem:[%s5245_s27 + $0xb0] sm:$0xff] %v4033_v59   ;;  %v1400_v61 = vpop.f32.mrb[60].mxu1  ;;  %v1593_v2 = vpop.f32.mrb[60].mxu0 }
 0x1f4   : > { %v1402_v3 = vpop.f32.mrb[61].mxu1  ;;  %v1595_v8 = vpop.f32.mrb[61].mxu0  ;;  %v1401_v17 = vadd.f32 %v1400_v61, %v5218_v43  ;;  %v1594_v20 = vadd.f32 %v1593_v2, %v5221_v62 }
 0x1f5   : > { %v1404_v9 = vpop.f32.mrb[62].mxu1  ;;  %v1597_v16 = vpop.f32.mrb[62].mxu0  ;;  %v1403_v25 = vadd.f32 %v1402_v3, %v5227_v1  ;;  %v1596_v26 = vadd.f32 %v1595_v8, %v5230_v54 }
 0x1f6   : > { %v1405_v21 = vadd.f32 %v1404_v9, %v5218_v43  ;;  %v1598_v22 = vadd.f32 %v1597_v16, %v5221_v62  ;;  %v1406_v23 = vpop.f32.mrb[63].mxu1  ;;  %v1599_v24 = vpop.f32.mrb[63].mxu0 }
 0x1f7   : > { %v1407_v27 = vadd.f32 %v1406_v23, %v5227_v1  ;;  %v1600_v28 = vadd.f32 %v1599_v24, %v5230_v54 }
 0x1f8   : > { %v3718_v29 = vpack.c.bf16 %v1405_v21, %v1401_v17  ;;  %v3798_v30 = vpack.c.bf16 %v1598_v22, %v1594_v20 }
 0x1f9   : > { %v3958_v31 = vpack.c.bf16 %v1407_v27, %v1403_v25  ;;  %v4038_v32 = vpack.c.bf16 %v1600_v28, %v1596_v26 }
 0x1fa   : > { %4101 = vst [vmem:[%s5241_s14 + $0x38] sm:$0xff] %v3718_v29   ;;  %4116 = vst [vmem:[%s5245_s27 + $0x38] sm:$0xff] %v3798_v30  }
 0x1fb   : > { %4148 = vst [vmem:[%s5241_s14 + $0xb8] sm:$0xff] %v3958_v31   ;;  %4164 = vst [vmem:[%s5245_s27 + $0xb8] sm:$0xff] %v4038_v32   ;;  %v1410_v33 = vpop.f32.mrb[64].mxu1  ;;  %v1603_v34 = vpop.f32.mrb[64].mxu0 }
 0x1fc   : > { %v1412_v36 = vpop.f32.mrb[65].mxu1  ;;  %v1605_v38 = vpop.f32.mrb[65].mxu0  ;;  %v1411_v41 = vadd.f32 %v1410_v33, %v5218_v43  ;;  %v1604_v44 = vadd.f32 %v1603_v34, %v5221_v62 }
 0x1fd   : > { %v1414_v39 = vpop.f32.mrb[66].mxu1  ;;  %v1607_v40 = vpop.f32.mrb[66].mxu0  ;;  %v1413_v51 = vadd.f32 %v1412_v36, %v5227_v1  ;;  %v1606_v52 = vadd.f32 %v1605_v38, %v5230_v54 }
 0x1fe   : > { %v1415_v45 = vadd.f32 %v1414_v39, %v5218_v43  ;;  %v1608_v46 = vadd.f32 %v1607_v40, %v5221_v62  ;;  %v1416_v48 = vpop.f32.mrb[67].mxu1  ;;  %v1609_v50 = vpop.f32.mrb[67].mxu0 }
 0x1ff   : > { %v1417_v15 = vadd.f32 %v1416_v48, %v5227_v1  ;;  %v1610_v53 = vadd.f32 %v1609_v50, %v5230_v54 }
 0x200   : > { %v3723_v56 = vpack.c.bf16 %v1415_v45, %v1411_v41  ;;  %v3803_v57 = vpack.c.bf16 %v1608_v46, %v1604_v44 }
 0x201   : > { %v3963_v58 = vpack.c.bf16 %v1417_v15, %v1413_v51  ;;  %v4043_v60 = vpack.c.bf16 %v1610_v53, %v1606_v52 }
 0x202   : > { %4102 = vst [vmem:[%s5241_s14 + $0x40] sm:$0xff] %v3723_v56   ;;  %4117 = vst [vmem:[%s5245_s27 + $0x40] sm:$0xff] %v3803_v57  }
 0x203   : > { %4149 = vst [vmem:[%s5241_s14 + $0xc0] sm:$0xff] %v3963_v58   ;;  %4165 = vst [vmem:[%s5245_s27 + $0xc0] sm:$0xff] %v4043_v60   ;;  %v1420_v63 = vpop.f32.mrb[68].mxu1  ;;  %v1613_v0 = vpop.f32.mrb[68].mxu0 }
 0x204   : > { %v1422_v4 = vpop.f32.mrb[69].mxu1  ;;  %v1615_v5 = vpop.f32.mrb[69].mxu0  ;;  %v1421_v10 = vadd.f32 %v1420_v63, %v5218_v43  ;;  %v1614_v11 = vadd.f32 %v1613_v0, %v5221_v62 }
 0x205   : > { %v1424_v6 = vpop.f32.mrb[70].mxu1  ;;  %v1617_v7 = vpop.f32.mrb[70].mxu0  ;;  %v1423_v13 = vadd.f32 %v1422_v4, %v5227_v1  ;;  %v1616_v37 = vadd.f32 %v1615_v5, %v5230_v54 }
 0x206   : > { %v1425_v12 = vadd.f32 %v1424_v6, %v5218_v43  ;;  %v1618_v14 = vadd.f32 %v1617_v7, %v5221_v62  ;;  %v1426_v18 = vpop.f32.mrb[71].mxu1  ;;  %v1619_v19 = vpop.f32.mrb[71].mxu0 }
 0x207   : > { %v1427_v35 = vadd.f32 %v1426_v18, %v5227_v1  ;;  %v1620_v42 = vadd.f32 %v1619_v19, %v5230_v54 }
 0x208   : > { %v3728_v47 = vpack.c.bf16 %v1425_v12, %v1421_v10  ;;  %v3808_v49 = vpack.c.bf16 %v1618_v14, %v1614_v11 }
 0x209   : > { %v3968_v55 = vpack.c.bf16 %v1427_v35, %v1423_v13  ;;  %v4048_v59 = vpack.c.bf16 %v1620_v42, %v1616_v37 }
 0x20a   : > { %4103 = vst [vmem:[%s5241_s14 + $0x48] sm:$0xff] %v3728_v47   ;;  %4118 = vst [vmem:[%s5245_s27 + $0x48] sm:$0xff] %v3808_v49  }
 0x20b   : > { %4150 = vst [vmem:[%s5241_s14 + $0xc8] sm:$0xff] %v3968_v55   ;;  %4166 = vst [vmem:[%s5245_s27 + $0xc8] sm:$0xff] %v4048_v59   ;;  %v1430_v61 = vpop.f32.mrb[72].mxu1  ;;  %v1623_v2 = vpop.f32.mrb[72].mxu0 }
 0x20c   : > { %v1432_v3 = vpop.f32.mrb[73].mxu1  ;;  %v1625_v8 = vpop.f32.mrb[73].mxu0  ;;  %v1431_v17 = vadd.f32 %v1430_v61, %v5218_v43  ;;  %v1624_v20 = vadd.f32 %v1623_v2, %v5221_v62 }
 0x20d   : > { %v1434_v9 = vpop.f32.mrb[74].mxu1  ;;  %v1627_v16 = vpop.f32.mrb[74].mxu0  ;;  %v1433_v25 = vadd.f32 %v1432_v3, %v5227_v1  ;;  %v1626_v26 = vadd.f32 %v1625_v8, %v5230_v54 }
 0x20e   : > { %v1435_v21 = vadd.f32 %v1434_v9, %v5218_v43  ;;  %v1628_v22 = vadd.f32 %v1627_v16, %v5221_v62  ;;  %v1436_v23 = vpop.f32.mrb[75].mxu1  ;;  %v1629_v24 = vpop.f32.mrb[75].mxu0 }
 0x20f   : > { %v1437_v27 = vadd.f32 %v1436_v23, %v5227_v1  ;;  %v1630_v28 = vadd.f32 %v1629_v24, %v5230_v54 }
 0x210   : > { %v3733_v29 = vpack.c.bf16 %v1435_v21, %v1431_v17  ;;  %v3813_v30 = vpack.c.bf16 %v1628_v22, %v1624_v20 }
 0x211   : > { %v3973_v31 = vpack.c.bf16 %v1437_v27, %v1433_v25  ;;  %v4053_v32 = vpack.c.bf16 %v1630_v28, %v1626_v26 }
 0x212   : > { %4104 = vst [vmem:[%s5241_s14 + $0x50] sm:$0xff] %v3733_v29   ;;  %4119 = vst [vmem:[%s5245_s27 + $0x50] sm:$0xff] %v3813_v30  }
 0x213   : > { %4151 = vst [vmem:[%s5241_s14 + $0xd0] sm:$0xff] %v3973_v31   ;;  %4167 = vst [vmem:[%s5245_s27 + $0xd0] sm:$0xff] %v4053_v32   ;;  %v1440_v33 = vpop.f32.mrb[76].mxu1  ;;  %v1633_v34 = vpop.f32.mrb[76].mxu0 }
 0x214   : > { %v1442_v36 = vpop.f32.mrb[77].mxu1  ;;  %v1635_v38 = vpop.f32.mrb[77].mxu0  ;;  %v1441_v41 = vadd.f32 %v1440_v33, %v5218_v43  ;;  %v1634_v44 = vadd.f32 %v1633_v34, %v5221_v62 }
 0x215   : > { %v1444_v39 = vpop.f32.mrb[78].mxu1  ;;  %v1637_v40 = vpop.f32.mrb[78].mxu0  ;;  %v1443_v51 = vadd.f32 %v1442_v36, %v5227_v1  ;;  %v1636_v52 = vadd.f32 %v1635_v38, %v5230_v54 }
 0x216   : > { %v1445_v45 = vadd.f32 %v1444_v39, %v5218_v43  ;;  %v1638_v46 = vadd.f32 %v1637_v40, %v5221_v62  ;;  %v1446_v48 = vpop.f32.mrb[79].mxu1  ;;  %v1639_v50 = vpop.f32.mrb[79].mxu0 }
 0x217   : > { %v1447_v15 = vadd.f32 %v1446_v48, %v5227_v1  ;;  %v1640_v53 = vadd.f32 %v1639_v50, %v5230_v54 }
 0x218   : > { %v3738_v56 = vpack.c.bf16 %v1445_v45, %v1441_v41  ;;  %v3818_v57 = vpack.c.bf16 %v1638_v46, %v1634_v44 }
 0x219   : > { %v3978_v58 = vpack.c.bf16 %v1447_v15, %v1443_v51  ;;  %v4058_v60 = vpack.c.bf16 %v1640_v53, %v1636_v52 }
 0x21a   : > { %4105 = vst [vmem:[%s5241_s14 + $0x58] sm:$0xff] %v3738_v56   ;;  %4120 = vst [vmem:[%s5245_s27 + $0x58] sm:$0xff] %v3818_v57  }
 0x21b   : > { %4152 = vst [vmem:[%s5241_s14 + $0xd8] sm:$0xff] %v3978_v58   ;;  %4168 = vst [vmem:[%s5245_s27 + $0xd8] sm:$0xff] %v4058_v60   ;;  %v1450_v63 = vpop.f32.mrb[80].mxu1  ;;  %v1643_v0 = vpop.f32.mrb[80].mxu0 }
 0x21c   : > { %v1452_v4 = vpop.f32.mrb[81].mxu1  ;;  %v1645_v5 = vpop.f32.mrb[81].mxu0  ;;  %v1451_v10 = vadd.f32 %v1450_v63, %v5218_v43  ;;  %v1644_v11 = vadd.f32 %v1643_v0, %v5221_v62 }
 0x21d   : > { %v1454_v6 = vpop.f32.mrb[82].mxu1  ;;  %v1647_v7 = vpop.f32.mrb[82].mxu0  ;;  %v1453_v13 = vadd.f32 %v1452_v4, %v5227_v1  ;;  %v1646_v37 = vadd.f32 %v1645_v5, %v5230_v54 }
 0x21e   : > { %v1455_v12 = vadd.f32 %v1454_v6, %v5218_v43  ;;  %v1648_v14 = vadd.f32 %v1647_v7, %v5221_v62  ;;  %v1456_v18 = vpop.f32.mrb[83].mxu1  ;;  %v1649_v19 = vpop.f32.mrb[83].mxu0 }
 0x21f   : > { %v1457_v35 = vadd.f32 %v1456_v18, %v5227_v1  ;;  %v1650_v42 = vadd.f32 %v1649_v19, %v5230_v54 }
 0x220   : > { %v3743_v47 = vpack.c.bf16 %v1455_v12, %v1451_v10  ;;  %v3823_v49 = vpack.c.bf16 %v1648_v14, %v1644_v11 }
 0x221   : > { %v3983_v55 = vpack.c.bf16 %v1457_v35, %v1453_v13  ;;  %v4063_v59 = vpack.c.bf16 %v1650_v42, %v1646_v37 }
 0x222   : > { %4106 = vst [vmem:[%s5241_s14 + $0x60] sm:$0xff] %v3743_v47   ;;  %4121 = vst [vmem:[%s5245_s27 + $0x60] sm:$0xff] %v3823_v49  }
 0x223   : > { %4153 = vst [vmem:[%s5241_s14 + $0xe0] sm:$0xff] %v3983_v55   ;;  %4169 = vst [vmem:[%s5245_s27 + $0xe0] sm:$0xff] %v4063_v59   ;;  %v1460_v61 = vpop.f32.mrb[84].mxu1  ;;  %v1653_v2 = vpop.f32.mrb[84].mxu0 }
 0x224   : > { %v1462_v3 = vpop.f32.mrb[85].mxu1  ;;  %v1655_v8 = vpop.f32.mrb[85].mxu0  ;;  %v1461_v17 = vadd.f32 %v1460_v61, %v5218_v43  ;;  %v1654_v20 = vadd.f32 %v1653_v2, %v5221_v62 }
 0x225   : > { %v1464_v9 = vpop.f32.mrb[86].mxu1  ;;  %v1657_v16 = vpop.f32.mrb[86].mxu0  ;;  %v1463_v25 = vadd.f32 %v1462_v3, %v5227_v1  ;;  %v1656_v26 = vadd.f32 %v1655_v8, %v5230_v54 }
 0x226   : > { %v1465_v21 = vadd.f32 %v1464_v9, %v5218_v43  ;;  %v1658_v22 = vadd.f32 %v1657_v16, %v5221_v62  ;;  %v1466_v23 = vpop.f32.mrb[87].mxu1  ;;  %v1659_v24 = vpop.f32.mrb[87].mxu0 }
 0x227   : > { %v1467_v27 = vadd.f32 %v1466_v23, %v5227_v1  ;;  %v1660_v28 = vadd.f32 %v1659_v24, %v5230_v54 }
 0x228   : > { %v3748_v29 = vpack.c.bf16 %v1465_v21, %v1461_v17  ;;  %v3828_v30 = vpack.c.bf16 %v1658_v22, %v1654_v20 }
 0x229   : > { %v3988_v31 = vpack.c.bf16 %v1467_v27, %v1463_v25  ;;  %v4068_v32 = vpack.c.bf16 %v1660_v28, %v1656_v26 }
 0x22a   : > { %4107 = vst [vmem:[%s5241_s14 + $0x68] sm:$0xff] %v3748_v29   ;;  %4122 = vst [vmem:[%s5245_s27 + $0x68] sm:$0xff] %v3828_v30  }
 0x22b   : > { %4154 = vst [vmem:[%s5241_s14 + $0xe8] sm:$0xff] %v3988_v31   ;;  %4170 = vst [vmem:[%s5245_s27 + $0xe8] sm:$0xff] %v4068_v32   ;;  %v1470_v33 = vpop.f32.mrb[88].mxu1  ;;  %v1663_v34 = vpop.f32.mrb[88].mxu0 }
 0x22c   : > { %v1472_v36 = vpop.f32.mrb[89].mxu1  ;;  %v1665_v38 = vpop.f32.mrb[89].mxu0  ;;  %v1471_v41 = vadd.f32 %v1470_v33, %v5218_v43  ;;  %v1664_v44 = vadd.f32 %v1663_v34, %v5221_v62 }
 0x22d   : > { %v1474_v39 = vpop.f32.mrb[90].mxu1  ;;  %v1667_v40 = vpop.f32.mrb[90].mxu0  ;;  %v1473_v51 = vadd.f32 %v1472_v36, %v5227_v1  ;;  %v1666_v52 = vadd.f32 %v1665_v38, %v5230_v54 }
 0x22e   : > { %v1475_v45 = vadd.f32 %v1474_v39, %v5218_v43  ;;  %v1668_v46 = vadd.f32 %v1667_v40, %v5221_v62  ;;  %v1476_v48 = vpop.f32.mrb[91].mxu1  ;;  %v1669_v50 = vpop.f32.mrb[91].mxu0 }
 0x22f   : > { %v1477_v15 = vadd.f32 %v1476_v48, %v5227_v1  ;;  %v1670_v53 = vadd.f32 %v1669_v50, %v5230_v54 }
 0x230   : > { %v3753_v56 = vpack.c.bf16 %v1475_v45, %v1471_v41  ;;  %v3833_v57 = vpack.c.bf16 %v1668_v46, %v1664_v44 }
 0x231   : > { %v3993_v58 = vpack.c.bf16 %v1477_v15, %v1473_v51  ;;  %v4073_v60 = vpack.c.bf16 %v1670_v53, %v1666_v52 }
 0x232   : > { %4108 = vst [vmem:[%s5241_s14 + $0x70] sm:$0xff] %v3753_v56   ;;  %4123 = vst [vmem:[%s5245_s27 + $0x70] sm:$0xff] %v3833_v57  }
 0x233   : > { %4155 = vst [vmem:[%s5241_s14 + $0xf0] sm:$0xff] %v3993_v58   ;;  %4171 = vst [vmem:[%s5245_s27 + $0xf0] sm:$0xff] %v4073_v60   ;;  %v1480_v63 = vpop.f32.mrb[92].mxu1  ;;  %v1673_v0 = vpop.f32.mrb[92].mxu0 }
 0x234   : > { %v1482_v4 = vpop.f32.mrb[93].mxu1  ;;  %v1675_v5 = vpop.f32.mrb[93].mxu0  ;;  %v1481_v10 = vadd.f32 %v1480_v63, %v5218_v43  ;;  %v1674_v11 = vadd.f32 %v1673_v0, %v5221_v62 }
 0x235   : > { %v1484_v6 = vpop.f32.mrb[94].mxu1  ;;  %v1677_v7 = vpop.f32.mrb[94].mxu0  ;;  %v1483_v13 = vadd.f32 %v1482_v4, %v5227_v1  ;;  %v1676_v37 = vadd.f32 %v1675_v5, %v5230_v54 }
 0x236   : > { %v1485_v12 = vadd.f32 %v1484_v6, %v5218_v43  ;;  %v1678_v14 = vadd.f32 %v1677_v7, %v5221_v62  ;;  %v1486_v18 = vpop.f32.mrb[95].mxu1  ;;  %v1679_v19 = vpop.f32.mrb[95].mxu0 }
 0x237   : > { %v1487_v35 = vadd.f32 %v1486_v18, %v5227_v1  ;;  %v1680_v42 = vadd.f32 %v1679_v19, %v5230_v54 }
 0x238   : > { %v3758_v47 = vpack.c.bf16 %v1485_v12, %v1481_v10  ;;  %v3838_v49 = vpack.c.bf16 %v1678_v14, %v1674_v11 }
 0x239   : > { %v3998_v55 = vpack.c.bf16 %v1487_v35, %v1483_v13  ;;  %v4078_v59 = vpack.c.bf16 %v1680_v42, %v1676_v37 }
 0x23a   : > { %4109 = vst [vmem:[%s5241_s14 + $0x78] sm:$0xff] %v3758_v47   ;;  %4124 = vst [vmem:[%s5245_s27 + $0x78] sm:$0xff] %v3838_v49  }
 0x23b   : > { %4156 = vst [vmem:[%s5241_s14 + $0xf8] sm:$0xff] %v3998_v55   ;;  %4172 = vst [vmem:[%s5245_s27 + $0xf8] sm:$0xff] %v4078_v59  }
 0x23c   : > { %s3396_s15 = sshll.u32 %s4659_s21, 5  ;;  %s3397_s16 = sshll.u32 %s4663_s22, 7 }
 0x23d   : > { %s2668_s17 = sadd.s32 %s3397_s16, %s3396_s15  ;;  %s2687_s6 = sshll.u32 %s5125_s28, 4  ;;  %s2688_s6 = int_to_ptr.vmem [resolvable:$true] %s2687_s6 }
 0x23e   : > { %s5438_s9 = sshll.u32 %s2668_s17, 6  ;;  %s4683_s13 = smov 2048  }
 0x23f   : > { %s2670_s29 = scalar_lea.hbm %s5531_s3, %s5438_s9  ;;  %4211 = sst [smem:[#allocation12]] (%p4837_p11), %s4683_s13 }
 0x240   : > { %s4684_s23 = smov 4096   ;;  %s4685_s21 = smov 32  }
 0x241   : > { %4212 = sst [smem:[#allocation12 + $0x1]] (%p4837_p11), %s4684_s23  ;;  %s4686_s22 = smov 64  }
 0x242   : > { %4213 = sst [smem:[#allocation12 + $0x2]] (%p4837_p11), %s4685_s21  ;;  %s4687_s12 = smov 4  }
 0x243   : > { %4214 = sst [smem:[#allocation12 + $0x3]] (%p4837_p11), %s4686_s22  ;;  %s4688_s1 = smov [#allocation11]  }
 0x244   : > { %4215 = sst [smem:[#allocation12 + $0x4]] (%p4837_p11), %s4686_s22  ;;  %s4689_s5 = smov 0  }
 0x245   : > { %4216 = sst [smem:[#allocation12 + $0x5]] (%p4837_p11), %s4687_s12 }
 0x246   : > { %4217 = dma.general (%p4837_p11), %s2688_s6, 4096, %s2670_s29, %s2646_s18, %s4688_s1, [#allocation12], %s4689_s5, 0  }
 0x247   : > { %s2717_s15 = scalar_lea.hbm %s5532_s4, %s5438_s9  ;;  %s2734_s16 = sshll.u32 %s5241_s14, 4  ;;  %s2735_s16 = int_to_ptr.vmem [resolvable:$true] %s2734_s16 }
 0x248   : > { %s4690_s17 = smov 2048   ;;  %s4691_s18 = smov 4096  }
 0x249   : > { %4218 = sst [smem:[#allocation14]] (%p4837_p11), %s4690_s17  ;;  %s4692_s6 = smov 32  }
 0x24a   : > { %4219 = sst [smem:[#allocation14 + $0x1]] (%p4837_p11), %s4691_s18  ;;  %s4693_s26 = smov 64  }
 0x24b   : > { %4220 = sst [smem:[#allocation14 + $0x2]] (%p4837_p11), %s4692_s6  ;;  %s4694_s10 = smov 4  }
 0x24c   : > { %4221 = sst [smem:[#allocation14 + $0x3]] (%p4837_p11), %s4693_s26  ;;  %s4695_s29 = smov [#allocation13]  }
 0x24d   : > { %4222 = sst [smem:[#allocation14 + $0x4]] (%p4837_p11), %s4693_s26  ;;  %s4696_s14 = smov 0  }
 0x24e   : > { %4223 = sst [smem:[#allocation14 + $0x5]] (%p4837_p11), %s4694_s10 }
 0x24f   : > { %4224 = dma.general (%p4837_p11), %s2735_s16, 4096, %s2717_s15, %s5433_s7, %s4695_s29, [#allocation14], %s4696_s14, 0  }
 0x250   : > { %s5563_s21 = sld [smem:[#allocation27_spill]]  ;;  %s2781_s12 = sshll.u32 %s5245_s27, 4  ;;  %s2782_s12 = int_to_ptr.vmem [resolvable:$true] %s2781_s12 }
 0x251   : > { %s4697_s1 = smov 2048   ;;  %s4698_s5 = smov 4096  }
 0x252   : > { %4225 = sst [smem:[#allocation16]] (%p4837_p11), %s4697_s1  ;;  %s4699_s28 = smov 32  }
 0x253   : > { %4226 = sst [smem:[#allocation16 + $0x1]] (%p4837_p11), %s4698_s5  ;;  %s4700_s30 = smov 64  }
 0x254   : > { %4227 = sst [smem:[#allocation16 + $0x2]] (%p4837_p11), %s4699_s28  ;;  %s4701_s15 = smov 4  }
 0x255   : > { %4228 = sst [smem:[#allocation16 + $0x3]] (%p4837_p11), %s4700_s30  ;;  %s4703_s27 = smov 0  }
 0x256   : > { %s2764_s22 = scalar_lea.hbm %s5563_s21, %s5438_s9  ;;  %4229 = sst [smem:[#allocation16 + $0x4]] (%p4837_p11), %s4700_s30 }
 0x257   : > { %4230 = sst [smem:[#allocation16 + $0x5]] (%p4837_p11), %s4701_s15  ;;  %s4702_s9 = smov [#allocation15]  }
 0x258   : > { %4231 = dma.general (%p4837_p11), %s2782_s12, 4096, %s2764_s22, %s5433_s7, %s4702_s9, [#allocation16], %s4703_s27, 0  }
 0x259 PF: > { %s5564_s16 = sld [smem:[#allocation21_spill]]  ;;  %s5565_s17 = sld [smem:[#allocation23_spill]] }
 0x25a   : > { %p4256_p8 = scmp.ge.s32.totalorder %s4675_s25, 2 }
 0x25f   : > { %s2809_s18 = sand.u32 1, %s5564_s16   ;;  %p5566_p10 = scmp.ne.s32.totalorder %s5565_s17, 0 }
 0x260   : > { %s2810_s6 = scalar_lea.sflag [#allocation4], %s2809_s18 }
 0x261   : > { %p4244_p12 = pnand %p4256_p8, %p5566_p10 }
 0x263   : > { %4638 = dma.done.wait (!%p4244_p12), %s2810_s6, 4096  }
 0x264   : > { %4640 = vsyncadd (!%p4244_p12), %s2810_s6, 4294963200  ;;  %s5567_s26 = sadd.s32 4294967294, %s4675_s25  }
 0x265   : > { %s2818_s10 = sand.u32 1, %s5567_s26  }
 0x266   : > { %s2819_s29 = scalar_lea.sflag [#allocation9], %s2818_s10 }
 0x267   : > { %4642 = dma.done.wait (!%p4244_p12), %s2819_s29, 8192  }
 0x268   : > { %4644 = vsyncadd (!%p4244_p12), %s2819_s29, 4294959104  ;;  %s26_s25 = sadd.s32 1, %s4675_s25   ;;  %s5568_s21 = sld [smem:[#allocation22_spill]] }
 0x269   : > { %p23_p11 = scmp.ge.s32.totalorder %s26_s25, 6   ;;  %s5569_s23 = sld [smem:[#allocation24_spill]] }
 0x26a   : > { %s5570_s8 = sld [smem:[#allocation25_spill]]  ;;  %s5571_s18 = smov %s4651_s19 }
 0x26b   : > { %s5572_s19 = smov %s4655_s20  ;;  %s5573_s20 = smov %s4854_s11 }
 0x26c   : > { %s5574_s22 = smov %s4671_s24  ;;  %25 = sbr.rel (!%p23_p11) target bundleno = 13 (0xd), region = 131 }
 0x270   : > { %s5575_s24 = smov %s5570_s8 }
 0x273   :  { %2833 = vsyncpa [#allocation3], 1 }
 0x274   :  { %2835 = vsyncpa [#allocation3 + $0x1], 1 }
 0x275   :  { %2836 = vsyncpa [#allocation6], 1 }
 0x276   :  { %2837 = vsyncpa [#allocation4], 1 }
 0x277   :  { %2839 = vsyncpa [#allocation4 + $0x1], 1 }
 0x278   :  { %2840 = vsyncpa [#allocation9], 1 }
 0x279   :  { %2842 = vsyncpa [#allocation9 + $0x1], 1 }

</bundles_post_ra>
